<compile_context>
chip_gen: v7x
topology: tpu7x:2x2x1
jax: 0.10.0
libtpu: 0.0.40
codegen_flags: <defaults>
</compile_context>

<pallas_src>
import math

import jax
import jax.numpy as jnp
from jax.experimental import pallas as pl
from jax.experimental.pallas import tpu as pltpu

# --- ULAP constants (Song et al. learned coefficients & water Nrer values) ---
THETA0 = 0.51157954
THETA1 = 0.50516165
THETA2 = -0.90511117
LOG_NRER_B = math.log(0.97)
LOG_NRER_G = math.log(0.95)
LOG_NRER_R = math.log(0.83)
GF_RADIUS = 50          # guided-filter box radius used by RefinedTransmission
GF_EPS = 1e-3           # guided-filter epsilon
T_MIN = 1e-3            # numerical floor on refined transmission (avoid inf/NaN)
VMEM_LIMIT_BYTES = 64 * 1024 * 1024


# ---------------------------------------------------------------------------
# Kernel A: uint8 quantization + BGR + ULAP depth prior + global min/max
# ---------------------------------------------------------------------------
def depth_kernel(rgb_ref, depth_ref, dmin_ref, dmax_ref):
    # Emulate (x*255).astype(uint8): truncation toward zero == floor for x>=0.
    rgb255 = jnp.clip(jnp.floor(rgb_ref[...] * 255.0), 0.0, 255.0)   # (3,H,W)
    r = rgb255[0] * (1.0 / 255.0)
    g = rgb255[1] * (1.0 / 255.0)
    b = rgb255[2] * (1.0 / 255.0)
    depth = THETA0 + THETA1 * jnp.maximum(g, b) + THETA2 * r
    depth_ref[...] = depth
    dmin_ref[...] = jnp.min(depth, keepdims=True)   # (1,1)
    dmax_ref[...] = jnp.max(depth, keepdims=True)   # (1,1)


# ---------------------------------------------------------------------------
# Kernel B: stretch, d_0/d_f, transmissions, guided-filter refine, radiance
# ---------------------------------------------------------------------------
def ulap_main_kernel(rgb_ref, sc_ref, L_ref, R_ref, out_ref):
    H, W = out_ref.shape[1], out_ref.shape[2]

    # Re-derive the quantized BGR image in-kernel (a few VPU ops/px instead of
    # an extra (3,H,W) HBM roundtrip between the two pallas_calls).
    rgb255 = jnp.clip(jnp.floor(rgb_ref[...] * 255.0), 0.0, 255.0)   # (3,H,W)
    bgr255 = (rgb255[2], rgb255[1], rgb255[0])                       # B, G, R planes
    bgr01 = tuple(v * (1.0 / 255.0) for v in bgr255)

    # SMEM scalars: background light (BGR, in [0,1]) and raw-depth min/max.
    a01 = (sc_ref[0], sc_ref[1], sc_ref[2])
    dmin = sc_ref[3]
    dmax = sc_ref[4]

    # Depth prior recomputed + GlobalStretching fused in-kernel.
    depth = THETA0 + THETA1 * jnp.maximum(bgr01[1], bgr01[0]) + THETA2 * bgr01[2]
    depth = (depth - dmin) / (dmax - dmin + 1e-12)

    # --- DepthMin: d_0 = 1 - max_c |I_c - A_c| / max(A_c, 1 - A_c) ---
    d_max = None
    for c in range(3):
        a_c = a01[c]
        den = jnp.maximum(a_c, 1.0 - a_c)
        d = jnp.abs(bgr01[c] - a_c) / den
        d_max = d if d_max is None else jnp.maximum(d_max, d)
    d_f = 8.0 * (depth + (1.0 - d_max))

    # --- Transmission per channel: Nrer_c ** d_f  (EUP exp) ---
    tB = jnp.exp(d_f * LOG_NRER_B)
    tG = jnp.exp(d_f * LOG_NRER_G)
    tR = jnp.exp(d_f * LOG_NRER_R)

    # --- Normalized box filters: L' X R' directly gives the window mean.
    # L' (H,H) / R' (W,W) are bf16 pre-normalized band matrices.
    L = L_ref[...]
    R = R_ref[...]

    def box_mean_batch(xs):
        # R'-pass batched: one (k*H, W) x (W, W) bf16 matmul (sublane-stacked
        # batch; axis-0 concat is layout-safe).  L'-pass: k consecutive
        # matmuls reusing the resident L'.  f32 accumulation throughout.
        k = len(xs)
        xcat = jnp.concatenate(xs, axis=0).astype(jnp.bfloat16)        # (k*H, W)
        y = jnp.dot(xcat, R, preferred_element_type=jnp.float32)       # (k*H, W)
        yb = y.astype(jnp.bfloat16)
        return [
            jnp.dot(L, yb[i * H:(i + 1) * H, :],
                    preferred_element_type=jnp.float32)
            for i in range(k)
        ]

    # TODO(synk): reference RefinedTransmission uses an unspecified cv2 guided
    # filter; a grayscale-guide guided filter (radius=50, eps=1e-3) is used.
    guide = (bgr01[0] + bgr01[1] + bgr01[2]) * (1.0 / 3.0)
    ts = (tB, tG, tR)
    m = box_mean_batch([guide, guide * guide, ts[0], ts[1], ts[2],
                        guide * ts[0], guide * ts[1], guide * ts[2]])
    mean_g, mean_gg = m[0], m[1]
    mean_t = m[2:5]
    mean_gt = m[5:8]
    var_g = mean_gg - mean_g * mean_g

    ab = []
    for c in range(3):
        cov = mean_gt[c] - mean_g * mean_t[c]
        a = cov / (var_g + GF_EPS)
        b = mean_t[c] - a * mean_g
        ab.append(a)
        ab.append(b)
    mab = box_mean_batch(ab)                                           # 6 means

    # --- Scene radiance, clip [0,255], uint8 trunc, BGR->RGB, /255 ---
    for c in range(3):                                                 # 0=B,1=G,2=R
        t_c = mab[2 * c] * guide + mab[2 * c + 1]
        t_c = jnp.maximum(t_c, T_MIN)            # numerical floor
        a255 = a01[c] * 255.0
        s = (bgr255[c] - a255) / t_c + a255
        s = jnp.clip(s, 0.0, 255.0)
        out_ref[2 - c] = jnp.floor(s) * (1.0 / 255.0)                  # RGB order


# ---------------------------------------------------------------------------
# Wrapper
# ---------------------------------------------------------------------------
def _norm_band_matrices(H, W, radius):
    """Pre-normalized bf16 band matrices: L' X R' == windowed mean of X."""
    def band(n):
        idx = jnp.arange(n)
        return (jnp.abs(idx[:, None] - idx[None, :]) <= radius).astype(jnp.float32)

    bH = band(H)
    bW = band(W)
    rcount = jnp.sum(bH, axis=1, keepdims=True)        # (H,1) window heights
    ccount = jnp.sum(bW, axis=0, keepdims=True)        # (1,W) window widths
    Lm = (bH / rcount).astype(jnp.bfloat16)            # row-normalized
    Rm = (bW / ccount).astype(jnp.bfloat16)            # col-normalized
    return Lm, Rm


@jax.jit
def ulap_forward(x):
    """x: (1, 3, H, W) float RGB in [0, 1]  ->  (1, 3, H, W) float RGB in [0, 1]."""
    assert x.shape[0] == 1 and x.shape[1] == 3, "ULAP expects (1, 3, H, W) RGB"
    _, _, H, W = x.shape
    rgb = x[0].astype(jnp.float32)                                    # squeeze(0)

    cparams = pltpu.CompilerParams(
        dimension_semantics=("arbitrary",),
        vmem_limit_bytes=VMEM_LIMIT_BYTES,
    )
    # TODO(synk): single-block design; very large images need spatial tiling /
    # fast-guided-filter subsampling (v7x 64 MiB VMEM, v5e matmul cost).

    # Kernel A: depth map + global min/max (quantization + BGR fused in-kernel)
    depth_raw, dmin, dmax = pl.pallas_call(
        depth_kernel,
        out_shape=(
            jax.ShapeDtypeStruct((H, W), jnp.float32),
            jax.ShapeDtypeStruct((1, 1), jnp.float32),
            jax.ShapeDtypeStruct((1, 1), jnp.float32),
        ),
        grid=(1,),
        in_specs=[pl.BlockSpec((3, H, W), lambda i: (0, 0, 0))],
        out_specs=(
            pl.BlockSpec((H, W), lambda i: (0, 0)),
            pl.BlockSpec((1, 1), lambda i: (0, 0)),
            pl.BlockSpec((1, 1), lambda i: (0, 0)),
        ),
        compiler_params=cparams,
    )(rgb)

    # BackgroundLight (JAX glue: data-dependent top-k selection has no clean
    # Pallas equivalent).  The min/max stretch is monotone, so selecting the
    # farthest 0.1% on the raw depth gives identical indices.
    n_sel = max(1, int(0.001 * H * W))
    _, idx = jax.lax.top_k(depth_raw.reshape(-1), n_sel)
    cand_rgb = rgb.reshape(3, -1)[:, idx]                              # (3, n_sel)
    cand_bgr01 = jnp.clip(jnp.floor(cand_rgb * 255.0), 0.0, 255.0)[::-1] * (1.0 / 255.0)
    j = jnp.argmax(jnp.sum(cand_bgr01, axis=0))
    a01 = cand_bgr01[:, j]                                             # (3,) BGR in [0,1]

    scalars = jnp.concatenate(
        [a01, dmin.reshape(1), dmax.reshape(1)]).astype(jnp.float32)   # (5,) -> SMEM

    Lmat, Rmat = _norm_band_matrices(H, W, GF_RADIUS)                  # bf16

    # Kernel B: fused per-pixel pipeline + guided filter + scene radiance
    out = pl.pallas_call(
        ulap_main_kernel,
        out_shape=jax.ShapeDtypeStruct((3, H, W), jnp.float32),
        grid=(1,),
        in_specs=[
            pl.BlockSpec((3, H, W), lambda i: (0, 0, 0)),              # rgb [0,1]
            pl.BlockSpec(memory_space=pltpu.MemorySpace.SMEM),         # 5 scalars
            pl.BlockSpec((H, H), lambda i: (0, 0)),                    # L' (bf16)
            pl.BlockSpec((W, W), lambda i: (0, 0)),                    # R' (bf16)
        ],
        out_specs=pl.BlockSpec((3, H, W), lambda i: (0, 0, 0)),
        compiler_params=cparams,
    )(rgb, scalars, Lmat, Rmat)

    return out[None]                                                   # unsqueeze(0)


if __name__ == "__main__":
    key = jax.random.PRNGKey(0)
    x = jax.random.uniform(key, (1, 3, 16, 16), dtype=jnp.float32)     # (1,3,H,W) RGB
    y = ulap_forward(x)
    y = jax.block_until_ready(y)
    assert y.shape == (1, 3, 16, 16)
    assert bool(jnp.all(jnp.isfinite(y)))
    assert bool(jnp.all((y >= 0.0) & (y <= 1.0)))
    print("KERNEL_OK")
</pallas_src>

<mosaic_0001>
module attributes {stable_mosaic.version = 11 : i64} {
  func.func @depth_kernel(%arg0: i32, %arg1: memref<3x16x16xf32, #tpu.memory_space<vmem>>, %arg2: memref<16x16xf32, #tpu.memory_space<vmem>>, %arg3: memref<1x1xf32, #tpu.memory_space<vmem>>, %arg4: memref<1x1xf32, #tpu.memory_space<vmem>>) attributes {dimension_semantics = [#tpu.dimension_semantics<arbitrary>], iteration_bounds = array<i64: 1>, scalar_prefetch = 0 : i64, scratch_operands = 0 : i64, tpu.core_type = #tpu.core_type<tc>, window_params = [{pipeline_mode = #tpu.pipeline_mode<synchronous>, transform_indices = @transform_0, window_bounds = array<i64: 3, 16, 16>}, {pipeline_mode = #tpu.pipeline_mode<synchronous>, transform_indices = @transform_1, window_bounds = array<i64: 16, 16>}, {pipeline_mode = #tpu.pipeline_mode<synchronous>, transform_indices = @transform_2, window_bounds = array<i64: 1, 1>}, {pipeline_mode = #tpu.pipeline_mode<synchronous>, transform_indices = @transform_3, window_bounds = array<i64: 1, 1>}]} {
    %c0 = arith.constant 0 : index
    %c0_0 = arith.constant 0 : index
    %c0_1 = arith.constant 0 : index
    %0 = vector.load %arg1[%c0, %c0_0, %c0_1] : memref<3x16x16xf32, #tpu.memory_space<vmem>>, vector<3x16x16xf32>
    %cst = arith.constant 2.550000e+02 : f32
    %1 = vector.broadcast %cst : f32 to vector<3x16x16xf32>
    %2 = arith.mulf %0, %1 : vector<3x16x16xf32>
    %3 = math.floor %2 : vector<3x16x16xf32>
    %cst_2 = arith.constant 0.000000e+00 : f32
    %cst_3 = arith.constant 2.550000e+02 : f32
    %4 = vector.broadcast %cst_2 : f32 to vector<3x16x16xf32>
    %5 = arith.maximumf %4, %3 : vector<3x16x16xf32>
    %6 = vector.broadcast %cst_3 : f32 to vector<3x16x16xf32>
    %7 = arith.minimumf %6, %5 : vector<3x16x16xf32>
    %8 = vector.extract_strided_slice %7 {offsets = [0, 0, 0], sizes = [1, 16, 16], strides = [1, 1, 1]} : vector<3x16x16xf32> to vector<1x16x16xf32>
    %9 = vector.shape_cast %8 : vector<1x16x16xf32> to vector<16x16xf32>
    %cst_4 = arith.constant 0.00392156886 : f32
    %10 = vector.broadcast %cst_4 : f32 to vector<16x16xf32>
    %11 = arith.mulf %9, %10 : vector<16x16xf32>
    %12 = vector.extract_strided_slice %7 {offsets = [1, 0, 0], sizes = [1, 16, 16], strides = [1, 1, 1]} : vector<3x16x16xf32> to vector<1x16x16xf32>
    %13 = vector.shape_cast %12 : vector<1x16x16xf32> to vector<16x16xf32>
    %cst_5 = arith.constant 0.00392156886 : f32
    %14 = vector.broadcast %cst_5 : f32 to vector<16x16xf32>
    %15 = arith.mulf %13, %14 : vector<16x16xf32>
    %16 = vector.extract_strided_slice %7 {offsets = [2, 0, 0], sizes = [1, 16, 16], strides = [1, 1, 1]} : vector<3x16x16xf32> to vector<1x16x16xf32>
    %17 = vector.shape_cast %16 : vector<1x16x16xf32> to vector<16x16xf32>
    %cst_6 = arith.constant 0.00392156886 : f32
    %18 = vector.broadcast %cst_6 : f32 to vector<16x16xf32>
    %19 = arith.mulf %17, %18 : vector<16x16xf32>
    %20 = arith.maximumf %15, %19 : vector<16x16xf32>
    %cst_7 = arith.constant 0.505161643 : f32
    %21 = vector.broadcast %cst_7 : f32 to vector<16x16xf32>
    %22 = arith.mulf %21, %20 : vector<16x16xf32>
    %cst_8 = arith.constant 0.511579514 : f32
    %23 = vector.broadcast %cst_8 : f32 to vector<16x16xf32>
    %24 = arith.addf %23, %22 : vector<16x16xf32>
    %cst_9 = arith.constant -0.905111193 : f32
    %25 = vector.broadcast %cst_9 : f32 to vector<16x16xf32>
    %26 = arith.mulf %25, %11 : vector<16x16xf32>
    %27 = arith.addf %24, %26 : vector<16x16xf32>
    %c0_10 = arith.constant 0 : index
    %c0_11 = arith.constant 0 : index
    %28 = vector.load %arg2[%c0_10, %c0_11] : memref<16x16xf32, #tpu.memory_space<vmem>>, vector<16x16xf32>
    tpu.vector_store %arg2[%c0_10, %c0_11], %27 {strides = array<i32>} : memref<16x16xf32, #tpu.memory_space<vmem>>, vector<16x16xf32>,
    %29 = vector.shape_cast %27 : vector<16x16xf32> to vector<1x16x16xf32>
    %cst_12 = arith.constant dense<0x7F800000> : vector<1xf32>
    %30 = vector.multi_reduction <minimumf>, %29, %cst_12 [1, 2] : vector<1x16x16xf32> to vector<1xf32>
    %31 = vector.shape_cast %30 : vector<1xf32> to vector<1x1x1xf32>
    %32 = vector.extract %31[0, 0, 0] : f32 from vector<1x1x1xf32>
    %33 = vector.broadcast %32 : f32 to vector<1x1xf32>
    %c0_13 = arith.constant 0 : index
    %c0_14 = arith.constant 0 : index
    %34 = vector.load %arg3[%c0_13, %c0_14] : memref<1x1xf32, #tpu.memory_space<vmem>>, vector<1x1xf32>
    tpu.vector_store %arg3[%c0_13, %c0_14], %33 {strides = array<i32>} : memref<1x1xf32, #tpu.memory_space<vmem>>, vector<1x1xf32>,
    %35 = vector.shape_cast %27 : vector<16x16xf32> to vector<1x16x16xf32>
    %cst_15 = arith.constant dense<0xFF800000> : vector<1xf32>
    %36 = vector.multi_reduction <maximumf>, %35, %cst_15 [1, 2] : vector<1x16x16xf32> to vector<1xf32>
    %37 = vector.shape_cast %36 : vector<1xf32> to vector<1x1x1xf32>
    %38 = vector.extract %37[0, 0, 0] : f32 from vector<1x1x1xf32>
    %39 = vector.broadcast %38 : f32 to vector<1x1xf32>
    %c0_16 = arith.constant 0 : index
    %c0_17 = arith.constant 0 : index
    %40 = vector.load %arg4[%c0_16, %c0_17] : memref<1x1xf32, #tpu.memory_space<vmem>>, vector<1x1xf32>
    tpu.vector_store %arg4[%c0_16, %c0_17], %39 {strides = array<i32>} : memref<1x1xf32, #tpu.memory_space<vmem>>, vector<1x1xf32>,
    return
  }
  func.func @transform_0(%arg0: i32) -> (i32, i32, i32) {
    %c0_i32 = arith.constant 0 : i32
    %c0_i32_0 = arith.constant 0 : i32
    %c0_i32_1 = arith.constant 0 : i32
    %c0_i32_2 = arith.constant 0 : i32
    return %c0_i32, %c0_i32_0, %c0_i32_1 : i32, i32, i32
  }
  func.func @transform_1(%arg0: i32) -> (i32, i32) {
    %c0_i32 = arith.constant 0 : i32
    %c0_i32_0 = arith.constant 0 : i32
    %c0_i32_1 = arith.constant 0 : i32
    return %c0_i32, %c0_i32_0 : i32, i32
  }
  func.func @transform_2(%arg0: i32) -> (i32, i32) {
    %c0_i32 = arith.constant 0 : i32
    %c0_i32_0 = arith.constant 0 : i32
    %c0_i32_1 = arith.constant 0 : i32
    return %c0_i32, %c0_i32_0 : i32, i32
  }
  func.func @transform_3(%arg0: i32) -> (i32, i32) {
    %c0_i32 = arith.constant 0 : i32
    %c0_i32_0 = arith.constant 0 : i32
    %c0_i32_1 = arith.constant 0 : i32
    return %c0_i32, %c0_i32_0 : i32, i32
  }
}

module attributes {stable_mosaic.version = 11 : i64} {
  func.func @ulap_main_kernel(%arg0: i32, %arg1: memref<3x16x16xf32, #tpu.memory_space<vmem>>, %arg2: memref<5xf32, #tpu.memory_space<smem>>, %arg3: memref<16x16xbf16, #tpu.memory_space<vmem>>, %arg4: memref<16x16xbf16, #tpu.memory_space<vmem>>, %arg5: memref<3x16x16xf32, #tpu.memory_space<vmem>>) attributes {dimension_semantics = [#tpu.dimension_semantics<arbitrary>], iteration_bounds = array<i64: 1>, scalar_prefetch = 0 : i64, scratch_operands = 0 : i64, tpu.core_type = #tpu.core_type<tc>, window_params = [{pipeline_mode = #tpu.pipeline_mode<synchronous>, transform_indices = @transform_0, window_bounds = array<i64: 3, 16, 16>}, {transform_indices = @transform_1, window_bounds = array<i64: 5>}, {pipeline_mode = #tpu.pipeline_mode<synchronous>, transform_indices = @transform_2, window_bounds = array<i64: 16, 16>}, {pipeline_mode = #tpu.pipeline_mode<synchronous>, transform_indices = @transform_3, window_bounds = array<i64: 16, 16>}, {pipeline_mode = #tpu.pipeline_mode<synchronous>, transform_indices = @transform_4, window_bounds = array<i64: 3, 16, 16>}]} {
    %c0 = arith.constant 0 : index
    %c0_0 = arith.constant 0 : index
    %c0_1 = arith.constant 0 : index
    %0 = vector.load %arg1[%c0, %c0_0, %c0_1] : memref<3x16x16xf32, #tpu.memory_space<vmem>>, vector<3x16x16xf32>
    %cst = arith.constant 2.550000e+02 : f32
    %1 = vector.broadcast %cst : f32 to vector<3x16x16xf32>
    %2 = arith.mulf %0, %1 : vector<3x16x16xf32>
    %3 = math.floor %2 : vector<3x16x16xf32>
    %cst_2 = arith.constant 0.000000e+00 : f32
    %cst_3 = arith.constant 2.550000e+02 : f32
    %4 = vector.broadcast %cst_2 : f32 to vector<3x16x16xf32>
    %5 = arith.maximumf %4, %3 : vector<3x16x16xf32>
    %6 = vector.broadcast %cst_3 : f32 to vector<3x16x16xf32>
    %7 = arith.minimumf %6, %5 : vector<3x16x16xf32>
    %8 = vector.extract_strided_slice %7 {offsets = [2, 0, 0], sizes = [1, 16, 16], strides = [1, 1, 1]} : vector<3x16x16xf32> to vector<1x16x16xf32>
    %9 = vector.shape_cast %8 : vector<1x16x16xf32> to vector<16x16xf32>
    %10 = vector.extract_strided_slice %7 {offsets = [1, 0, 0], sizes = [1, 16, 16], strides = [1, 1, 1]} : vector<3x16x16xf32> to vector<1x16x16xf32>
    %11 = vector.shape_cast %10 : vector<1x16x16xf32> to vector<16x16xf32>
    %12 = vector.extract_strided_slice %7 {offsets = [0, 0, 0], sizes = [1, 16, 16], strides = [1, 1, 1]} : vector<3x16x16xf32> to vector<1x16x16xf32>
    %13 = vector.shape_cast %12 : vector<1x16x16xf32> to vector<16x16xf32>
    %cst_4 = arith.constant 0.00392156886 : f32
    %14 = vector.broadcast %cst_4 : f32 to vector<16x16xf32>
    %15 = arith.mulf %9, %14 : vector<16x16xf32>
    %cst_5 = arith.constant 0.00392156886 : f32
    %16 = vector.broadcast %cst_5 : f32 to vector<16x16xf32>
    %17 = arith.mulf %11, %16 : vector<16x16xf32>
    %cst_6 = arith.constant 0.00392156886 : f32
    %18 = vector.broadcast %cst_6 : f32 to vector<16x16xf32>
    %19 = arith.mulf %13, %18 : vector<16x16xf32>
    %c0_7 = arith.constant 0 : index
    %20 = memref.load %arg2[%c0_7] : memref<5xf32, #tpu.memory_space<smem>>
    %c1 = arith.constant 1 : index
    %21 = memref.load %arg2[%c1] : memref<5xf32, #tpu.memory_space<smem>>
    %c2 = arith.constant 2 : index
    %22 = memref.load %arg2[%c2] : memref<5xf32, #tpu.memory_space<smem>>
    %c3 = arith.constant 3 : index
    %23 = memref.load %arg2[%c3] : memref<5xf32, #tpu.memory_space<smem>>
    %c4 = arith.constant 4 : index
    %24 = memref.load %arg2[%c4] : memref<5xf32, #tpu.memory_space<smem>>
    %25 = arith.maximumf %17, %15 : vector<16x16xf32>
    %cst_8 = arith.constant 0.505161643 : f32
    %26 = vector.broadcast %cst_8 : f32 to vector<16x16xf32>
    %27 = arith.mulf %26, %25 : vector<16x16xf32>
    %cst_9 = arith.constant 0.511579514 : f32
    %28 = vector.broadcast %cst_9 : f32 to vector<16x16xf32>
    %29 = arith.addf %28, %27 : vector<16x16xf32>
    %cst_10 = arith.constant -0.905111193 : f32
    %30 = vector.broadcast %cst_10 : f32 to vector<16x16xf32>
    %31 = arith.mulf %30, %19 : vector<16x16xf32>
    %32 = arith.addf %29, %31 : vector<16x16xf32>
    %33 = vector.broadcast %23 : f32 to vector<16x16xf32>
    %34 = arith.subf %32, %33 : vector<16x16xf32>
    %35 = arith.subf %24, %23 : f32
    %cst_11 = arith.constant 9.99999996E-13 : f32
    %36 = arith.addf %35, %cst_11 : f32
    %37 = vector.broadcast %36 : f32 to vector<16x16xf32>
    %38 = arith.divf %34, %37 : vector<16x16xf32>
    %cst_12 = arith.constant 1.000000e+00 : f32
    %39 = arith.subf %cst_12, %20 : f32
    %40 = arith.maximumf %20, %39 : f32
    %41 = vector.broadcast %20 : f32 to vector<16x16xf32>
    %42 = arith.subf %15, %41 : vector<16x16xf32>
    %43 = math.absf %42 : vector<16x16xf32>
    %44 = vector.broadcast %40 : f32 to vector<16x16xf32>
    %45 = arith.divf %43, %44 : vector<16x16xf32>
    %cst_13 = arith.constant 1.000000e+00 : f32
    %46 = arith.subf %cst_13, %21 : f32
    %47 = arith.maximumf %21, %46 : f32
    %48 = vector.broadcast %21 : f32 to vector<16x16xf32>
    %49 = arith.subf %17, %48 : vector<16x16xf32>
    %50 = math.absf %49 : vector<16x16xf32>
    %51 = vector.broadcast %47 : f32 to vector<16x16xf32>
    %52 = arith.divf %50, %51 : vector<16x16xf32>
    %53 = arith.maximumf %45, %52 : vector<16x16xf32>
    %cst_14 = arith.constant 1.000000e+00 : f32
    %54 = arith.subf %cst_14, %22 : f32
    %55 = arith.maximumf %22, %54 : f32
    %56 = vector.broadcast %22 : f32 to vector<16x16xf32>
    %57 = arith.subf %19, %56 : vector<16x16xf32>
    %58 = math.absf %57 : vector<16x16xf32>
    %59 = vector.broadcast %55 : f32 to vector<16x16xf32>
    %60 = arith.divf %58, %59 : vector<16x16xf32>
    %61 = arith.maximumf %53, %60 : vector<16x16xf32>
    %cst_15 = arith.constant 1.000000e+00 : f32
    %62 = vector.broadcast %cst_15 : f32 to vector<16x16xf32>
    %63 = arith.subf %62, %61 : vector<16x16xf32>
    %64 = arith.addf %38, %63 : vector<16x16xf32>
    %cst_16 = arith.constant 8.000000e+00 : f32
    %65 = vector.broadcast %cst_16 : f32 to vector<16x16xf32>
    %66 = arith.mulf %65, %64 : vector<16x16xf32>
    %cst_17 = arith.constant -0.0304592084 : f32
    %67 = vector.broadcast %cst_17 : f32 to vector<16x16xf32>
    %68 = arith.mulf %66, %67 : vector<16x16xf32>
    %69 = math.exp %68 : vector<16x16xf32>
    %cst_18 = arith.constant -0.0512932949 : f32
    %70 = vector.broadcast %cst_18 : f32 to vector<16x16xf32>
    %71 = arith.mulf %66, %70 : vector<16x16xf32>
    %72 = math.exp %71 : vector<16x16xf32>
    %cst_19 = arith.constant -0.186329573 : f32
    %73 = vector.broadcast %cst_19 : f32 to vector<16x16xf32>
    %74 = arith.mulf %66, %73 : vector<16x16xf32>
    %75 = math.exp %74 : vector<16x16xf32>
    %c0_20 = arith.constant 0 : index
    %c0_21 = arith.constant 0 : index
    %76 = vector.load %arg3[%c0_20, %c0_21] : memref<16x16xbf16, #tpu.memory_space<vmem>>, vector<16x16xbf16>
    %c0_22 = arith.constant 0 : index
    %c0_23 = arith.constant 0 : index
    %77 = vector.load %arg4[%c0_22, %c0_23] : memref<16x16xbf16, #tpu.memory_space<vmem>>, vector<16x16xbf16>
    %78 = arith.addf %15, %17 : vector<16x16xf32>
    %79 = arith.addf %78, %19 : vector<16x16xf32>
    %cst_24 = arith.constant 0.333333343 : f32
    %80 = vector.broadcast %cst_24 : f32 to vector<16x16xf32>
    %81 = arith.mulf %79, %80 : vector<16x16xf32>
    %82 = arith.mulf %81, %81 : vector<16x16xf32>
    %83 = arith.mulf %81, %69 : vector<16x16xf32>
    %84 = arith.mulf %81, %72 : vector<16x16xf32>
    %85 = arith.mulf %81, %75 : vector<16x16xf32>
    %86 = tpu.concatenate %81, %82, %69, %72, %75, %83, %84, %85 in 0 : vector<16x16xf32>, vector<16x16xf32>, vector<16x16xf32>, vector<16x16xf32>, vector<16x16xf32>, vector<16x16xf32>, vector<16x16xf32>, vector<16x16xf32> -> vector<128x16xf32>
    %87 = arith.truncf %86 : vector<128x16xf32> to vector<128x16xbf16>
    %cst_25 = arith.constant dense<0.000000e+00> : vector<128x16xf32>
    %88 = tpu.matmul %87, %77, %cst_25 {dimension_numbers = #tpu.dot_dimension_numbers<[1], [0], [0], [1], [0, 0, 1, 1], [], []>} : vector<128x16xbf16>, vector<16x16xbf16>, vector<128x16xf32> -> vector<128x16xf32>
    %89 = arith.truncf %88 : vector<128x16xf32> to vector<128x16xbf16>
    %90 = vector.extract_strided_slice %89 {offsets = [0, 0], sizes = [16, 16], strides = [1, 1]} : vector<128x16xbf16> to vector<16x16xbf16>
    %cst_26 = arith.constant dense<0.000000e+00> : vector<16x16xf32>
    %91 = tpu.matmul %76, %90, %cst_26 {dimension_numbers = #tpu.dot_dimension_numbers<[1], [0], [0], [1], [0, 0, 1, 1], [], []>} : vector<16x16xbf16>, vector<16x16xbf16>, vector<16x16xf32> -> vector<16x16xf32>
    %92 = vector.extract_strided_slice %89 {offsets = [16, 0], sizes = [16, 16], strides = [1, 1]} : vector<128x16xbf16> to vector<16x16xbf16>
    %cst_27 = arith.constant dense<0.000000e+00> : vector<16x16xf32>
    %93 = tpu.matmul %76, %92, %cst_27 {dimension_numbers = #tpu.dot_dimension_numbers<[1], [0], [0], [1], [0, 0, 1, 1], [], []>} : vector<16x16xbf16>, vector<16x16xbf16>, vector<16x16xf32> -> vector<16x16xf32>
    %94 = vector.extract_strided_slice %89 {offsets = [32, 0], sizes = [16, 16], strides = [1, 1]} : vector<128x16xbf16> to vector<16x16xbf16>
    %cst_28 = arith.constant dense<0.000000e+00> : vector<16x16xf32>
    %95 = tpu.matmul %76, %94, %cst_28 {dimension_numbers = #tpu.dot_dimension_numbers<[1], [0], [0], [1], [0, 0, 1, 1], [], []>} : vector<16x16xbf16>, vector<16x16xbf16>, vector<16x16xf32> -> vector<16x16xf32>
    %96 = vector.extract_strided_slice %89 {offsets = [48, 0], sizes = [16, 16], strides = [1, 1]} : vector<128x16xbf16> to vector<16x16xbf16>
    %cst_29 = arith.constant dense<0.000000e+00> : vector<16x16xf32>
    %97 = tpu.matmul %76, %96, %cst_29 {dimension_numbers = #tpu.dot_dimension_numbers<[1], [0], [0], [1], [0, 0, 1, 1], [], []>} : vector<16x16xbf16>, vector<16x16xbf16>, vector<16x16xf32> -> vector<16x16xf32>
    %98 = vector.extract_strided_slice %89 {offsets = [64, 0], sizes = [16, 16], strides = [1, 1]} : vector<128x16xbf16> to vector<16x16xbf16>
    %cst_30 = arith.constant dense<0.000000e+00> : vector<16x16xf32>
    %99 = tpu.matmul %76, %98, %cst_30 {dimension_numbers = #tpu.dot_dimension_numbers<[1], [0], [0], [1], [0, 0, 1, 1], [], []>} : vector<16x16xbf16>, vector<16x16xbf16>, vector<16x16xf32> -> vector<16x16xf32>
    %100 = vector.extract_strided_slice %89 {offsets = [80, 0], sizes = [16, 16], strides = [1, 1]} : vector<128x16xbf16> to vector<16x16xbf16>
    %cst_31 = arith.constant dense<0.000000e+00> : vector<16x16xf32>
    %101 = tpu.matmul %76, %100, %cst_31 {dimension_numbers = #tpu.dot_dimension_numbers<[1], [0], [0], [1], [0, 0, 1, 1], [], []>} : vector<16x16xbf16>, vector<16x16xbf16>, vector<16x16xf32> -> vector<16x16xf32>
    %102 = vector.extract_strided_slice %89 {offsets = [96, 0], sizes = [16, 16], strides = [1, 1]} : vector<128x16xbf16> to vector<16x16xbf16>
    %cst_32 = arith.constant dense<0.000000e+00> : vector<16x16xf32>
    %103 = tpu.matmul %76, %102, %cst_32 {dimension_numbers = #tpu.dot_dimension_numbers<[1], [0], [0], [1], [0, 0, 1, 1], [], []>} : vector<16x16xbf16>, vector<16x16xbf16>, vector<16x16xf32> -> vector<16x16xf32>
    %104 = vector.extract_strided_slice %89 {offsets = [112, 0], sizes = [16, 16], strides = [1, 1]} : vector<128x16xbf16> to vector<16x16xbf16>
    %cst_33 = arith.constant dense<0.000000e+00> : vector<16x16xf32>
    %105 = tpu.matmul %76, %104, %cst_33 {dimension_numbers = #tpu.dot_dimension_numbers<[1], [0], [0], [1], [0, 0, 1, 1], [], []>} : vector<16x16xbf16>, vector<16x16xbf16>, vector<16x16xf32> -> vector<16x16xf32>
    %106 = arith.mulf %91, %91 : vector<16x16xf32>
    %107 = arith.subf %93, %106 : vector<16x16xf32>
    %108 = arith.mulf %91, %95 : vector<16x16xf32>
    %109 = arith.subf %101, %108 : vector<16x16xf32>
    %cst_34 = arith.constant 1.000000e-03 : f32
    %110 = vector.broadcast %cst_34 : f32 to vector<16x16xf32>
    %111 = arith.addf %107, %110 : vector<16x16xf32>
    %112 = arith.divf %109, %111 : vector<16x16xf32>
    %113 = arith.mulf %112, %91 : vector<16x16xf32>
    %114 = arith.subf %95, %113 : vector<16x16xf32>
    %115 = arith.mulf %91, %97 : vector<16x16xf32>
    %116 = arith.subf %103, %115 : vector<16x16xf32>
    %cst_35 = arith.constant 1.000000e-03 : f32
    %117 = vector.broadcast %cst_35 : f32 to vector<16x16xf32>
    %118 = arith.addf %107, %117 : vector<16x16xf32>
    %119 = arith.divf %116, %118 : vector<16x16xf32>
    %120 = arith.mulf %119, %91 : vector<16x16xf32>
    %121 = arith.subf %97, %120 : vector<16x16xf32>
    %122 = arith.mulf %91, %99 : vector<16x16xf32>
    %123 = arith.subf %105, %122 : vector<16x16xf32>
    %cst_36 = arith.constant 1.000000e-03 : f32
    %124 = vector.broadcast %cst_36 : f32 to vector<16x16xf32>
    %125 = arith.addf %107, %124 : vector<16x16xf32>
    %126 = arith.divf %123, %125 : vector<16x16xf32>
    %127 = arith.mulf %126, %91 : vector<16x16xf32>
    %128 = arith.subf %99, %127 : vector<16x16xf32>
    %129 = tpu.concatenate %112, %114, %119, %121, %126, %128 in 0 : vector<16x16xf32>, vector<16x16xf32>, vector<16x16xf32>, vector<16x16xf32>, vector<16x16xf32>, vector<16x16xf32> -> vector<96x16xf32>
    %130 = arith.truncf %129 : vector<96x16xf32> to vector<96x16xbf16>
    %cst_37 = arith.constant dense<0.000000e+00> : vector<96x16xf32>
    %131 = tpu.matmul %130, %77, %cst_37 {dimension_numbers = #tpu.dot_dimension_numbers<[1], [0], [0], [1], [0, 0, 1, 1], [], []>} : vector<96x16xbf16>, vector<16x16xbf16>, vector<96x16xf32> -> vector<96x16xf32>
    %132 = arith.truncf %131 : vector<96x16xf32> to vector<96x16xbf16>
    %133 = vector.extract_strided_slice %132 {offsets = [0, 0], sizes = [16, 16], strides = [1, 1]} : vector<96x16xbf16> to vector<16x16xbf16>
    %cst_38 = arith.constant dense<0.000000e+00> : vector<16x16xf32>
    %134 = tpu.matmul %76, %133, %cst_38 {dimension_numbers = #tpu.dot_dimension_numbers<[1], [0], [0], [1], [0, 0, 1, 1], [], []>} : vector<16x16xbf16>, vector<16x16xbf16>, vector<16x16xf32> -> vector<16x16xf32>
    %135 = vector.extract_strided_slice %132 {offsets = [16, 0], sizes = [16, 16], strides = [1, 1]} : vector<96x16xbf16> to vector<16x16xbf16>
    %cst_39 = arith.constant dense<0.000000e+00> : vector<16x16xf32>
    %136 = tpu.matmul %76, %135, %cst_39 {dimension_numbers = #tpu.dot_dimension_numbers<[1], [0], [0], [1], [0, 0, 1, 1], [], []>} : vector<16x16xbf16>, vector<16x16xbf16>, vector<16x16xf32> -> vector<16x16xf32>
    %137 = vector.extract_strided_slice %132 {offsets = [32, 0], sizes = [16, 16], strides = [1, 1]} : vector<96x16xbf16> to vector<16x16xbf16>
    %cst_40 = arith.constant dense<0.000000e+00> : vector<16x16xf32>
    %138 = tpu.matmul %76, %137, %cst_40 {dimension_numbers = #tpu.dot_dimension_numbers<[1], [0], [0], [1], [0, 0, 1, 1], [], []>} : vector<16x16xbf16>, vector<16x16xbf16>, vector<16x16xf32> -> vector<16x16xf32>
    %139 = vector.extract_strided_slice %132 {offsets = [48, 0], sizes = [16, 16], strides = [1, 1]} : vector<96x16xbf16> to vector<16x16xbf16>
    %cst_41 = arith.constant dense<0.000000e+00> : vector<16x16xf32>
    %140 = tpu.matmul %76, %139, %cst_41 {dimension_numbers = #tpu.dot_dimension_numbers<[1], [0], [0], [1], [0, 0, 1, 1], [], []>} : vector<16x16xbf16>, vector<16x16xbf16>, vector<16x16xf32> -> vector<16x16xf32>
    %141 = vector.extract_strided_slice %132 {offsets = [64, 0], sizes = [16, 16], strides = [1, 1]} : vector<96x16xbf16> to vector<16x16xbf16>
    %cst_42 = arith.constant dense<0.000000e+00> : vector<16x16xf32>
    %142 = tpu.matmul %76, %141, %cst_42 {dimension_numbers = #tpu.dot_dimension_numbers<[1], [0], [0], [1], [0, 0, 1, 1], [], []>} : vector<16x16xbf16>, vector<16x16xbf16>, vector<16x16xf32> -> vector<16x16xf32>
    %143 = vector.extract_strided_slice %132 {offsets = [80, 0], sizes = [16, 16], strides = [1, 1]} : vector<96x16xbf16> to vector<16x16xbf16>
    %cst_43 = arith.constant dense<0.000000e+00> : vector<16x16xf32>
    %144 = tpu.matmul %76, %143, %cst_43 {dimension_numbers = #tpu.dot_dimension_numbers<[1], [0], [0], [1], [0, 0, 1, 1], [], []>} : vector<16x16xbf16>, vector<16x16xbf16>, vector<16x16xf32> -> vector<16x16xf32>
    %145 = arith.mulf %134, %81 : vector<16x16xf32>
    %146 = arith.addf %145, %136 : vector<16x16xf32>
    %cst_44 = arith.constant 1.000000e-03 : f32
    %147 = vector.broadcast %cst_44 : f32 to vector<16x16xf32>
    %148 = arith.maximumf %146, %147 : vector<16x16xf32>
    %cst_45 = arith.constant 2.550000e+02 : f32
    %149 = arith.mulf %20, %cst_45 : f32
    %150 = vector.broadcast %149 : f32 to vector<16x16xf32>
    %151 = arith.subf %9, %150 : vector<16x16xf32>
    %152 = arith.divf %151, %148 : vector<16x16xf32>
    %153 = vector.broadcast %149 : f32 to vector<16x16xf32>
    %154 = arith.addf %152, %153 : vector<16x16xf32>
    %cst_46 = arith.constant 0.000000e+00 : f32
    %cst_47 = arith.constant 2.550000e+02 : f32
    %155 = vector.broadcast %cst_46 : f32 to vector<16x16xf32>
    %156 = arith.maximumf %155, %154 : vector<16x16xf32>
    %157 = vector.broadcast %cst_47 : f32 to vector<16x16xf32>
    %158 = arith.minimumf %157, %156 : vector<16x16xf32>
    %159 = math.floor %158 : vector<16x16xf32>
    %cst_48 = arith.constant 0.00392156886 : f32
    %160 = vector.broadcast %cst_48 : f32 to vector<16x16xf32>
    %161 = arith.mulf %159, %160 : vector<16x16xf32>
    %c2_49 = arith.constant 2 : index
    %c0_50 = arith.constant 0 : index
    %c0_51 = arith.constant 0 : index
    %162 = vector.load %arg5[%c2_49, %c0_50, %c0_51] : memref<3x16x16xf32, #tpu.memory_space<vmem>>, vector<1x16x16xf32>
    %163 = vector.shape_cast %162 : vector<1x16x16xf32> to vector<16x16xf32>
    %164 = vector.shape_cast %161 : vector<16x16xf32> to vector<1x16x16xf32>
    tpu.vector_store %arg5[%c2_49, %c0_50, %c0_51], %164 {strides = array<i32>} : memref<3x16x16xf32, #tpu.memory_space<vmem>>, vector<1x16x16xf32>,
    %165 = arith.mulf %138, %81 : vector<16x16xf32>
    %166 = arith.addf %165, %140 : vector<16x16xf32>
    %cst_52 = arith.constant 1.000000e-03 : f32
    %167 = vector.broadcast %cst_52 : f32 to vector<16x16xf32>
    %168 = arith.maximumf %166, %167 : vector<16x16xf32>
    %cst_53 = arith.constant 2.550000e+02 : f32
    %169 = arith.mulf %21, %cst_53 : f32
    %170 = vector.broadcast %169 : f32 to vector<16x16xf32>
    %171 = arith.subf %11, %170 : vector<16x16xf32>
    %172 = arith.divf %171, %168 : vector<16x16xf32>
    %173 = vector.broadcast %169 : f32 to vector<16x16xf32>
    %174 = arith.addf %172, %173 : vector<16x16xf32>
    %cst_54 = arith.constant 0.000000e+00 : f32
    %cst_55 = arith.constant 2.550000e+02 : f32
    %175 = vector.broadcast %cst_54 : f32 to vector<16x16xf32>
    %176 = arith.maximumf %175, %174 : vector<16x16xf32>
    %177 = vector.broadcast %cst_55 : f32 to vector<16x16xf32>
    %178 = arith.minimumf %177, %176 : vector<16x16xf32>
    %179 = math.floor %178 : vector<16x16xf32>
    %cst_56 = arith.constant 0.00392156886 : f32
    %180 = vector.broadcast %cst_56 : f32 to vector<16x16xf32>
    %181 = arith.mulf %179, %180 : vector<16x16xf32>
    %c1_57 = arith.constant 1 : index
    %c0_58 = arith.constant 0 : index
    %c0_59 = arith.constant 0 : index
    %182 = vector.load %arg5[%c1_57, %c0_58, %c0_59] : memref<3x16x16xf32, #tpu.memory_space<vmem>>, vector<1x16x16xf32>
    %183 = vector.shape_cast %182 : vector<1x16x16xf32> to vector<16x16xf32>
    %184 = vector.shape_cast %181 : vector<16x16xf32> to vector<1x16x16xf32>
    tpu.vector_store %arg5[%c1_57, %c0_58, %c0_59], %184 {strides = array<i32>} : memref<3x16x16xf32, #tpu.memory_space<vmem>>, vector<1x16x16xf32>,
    %185 = arith.mulf %142, %81 : vector<16x16xf32>
    %186 = arith.addf %185, %144 : vector<16x16xf32>
    %cst_60 = arith.constant 1.000000e-03 : f32
    %187 = vector.broadcast %cst_60 : f32 to vector<16x16xf32>
    %188 = arith.maximumf %186, %187 : vector<16x16xf32>
    %cst_61 = arith.constant 2.550000e+02 : f32
    %189 = arith.mulf %22, %cst_61 : f32
    %190 = vector.broadcast %189 : f32 to vector<16x16xf32>
    %191 = arith.subf %13, %190 : vector<16x16xf32>
    %192 = arith.divf %191, %188 : vector<16x16xf32>
    %193 = vector.broadcast %189 : f32 to vector<16x16xf32>
    %194 = arith.addf %192, %193 : vector<16x16xf32>
    %cst_62 = arith.constant 0.000000e+00 : f32
    %cst_63 = arith.constant 2.550000e+02 : f32
    %195 = vector.broadcast %cst_62 : f32 to vector<16x16xf32>
    %196 = arith.maximumf %195, %194 : vector<16x16xf32>
    %197 = vector.broadcast %cst_63 : f32 to vector<16x16xf32>
    %198 = arith.minimumf %197, %196 : vector<16x16xf32>
    %199 = math.floor %198 : vector<16x16xf32>
    %cst_64 = arith.constant 0.00392156886 : f32
    %200 = vector.broadcast %cst_64 : f32 to vector<16x16xf32>
    %201 = arith.mulf %199, %200 : vector<16x16xf32>
    %c0_65 = arith.constant 0 : index
    %c0_66 = arith.constant 0 : index
    %c0_67 = arith.constant 0 : index
    %202 = vector.load %arg5[%c0_65, %c0_66, %c0_67] : memref<3x16x16xf32, #tpu.memory_space<vmem>>, vector<1x16x16xf32>
    %203 = vector.shape_cast %202 : vector<1x16x16xf32> to vector<16x16xf32>
    %204 = vector.shape_cast %201 : vector<16x16xf32> to vector<1x16x16xf32>
    tpu.vector_store %arg5[%c0_65, %c0_66, %c0_67], %204 {strides = array<i32>} : memref<3x16x16xf32, #tpu.memory_space<vmem>>, vector<1x16x16xf32>,
    return
  }
  func.func @transform_0(%arg0: i32) -> (i32, i32, i32) {
    %c0_i32 = arith.constant 0 : i32
    %c0_i32_0 = arith.constant 0 : i32
    %c0_i32_1 = arith.constant 0 : i32
    %c0_i32_2 = arith.constant 0 : i32
    return %c0_i32, %c0_i32_0, %c0_i32_1 : i32, i32, i32
  }
  func.func @transform_1(%arg0: i32) -> i32 {
    %c0_i32 = arith.constant 0 : i32
    %c0_i32_0 = arith.constant 0 : i32
    return %c0_i32 : i32
  }
  func.func @transform_2(%arg0: i32) -> (i32, i32) {
    %c0_i32 = arith.constant 0 : i32
    %c0_i32_0 = arith.constant 0 : i32
    %c0_i32_1 = arith.constant 0 : i32
    return %c0_i32, %c0_i32_0 : i32, i32
  }
  func.func @transform_3(%arg0: i32) -> (i32, i32) {
    %c0_i32 = arith.constant 0 : i32
    %c0_i32_0 = arith.constant 0 : i32
    %c0_i32_1 = arith.constant 0 : i32
    return %c0_i32, %c0_i32_0 : i32, i32
  }
  func.func @transform_4(%arg0: i32) -> (i32, i32, i32) {
    %c0_i32 = arith.constant 0 : i32
    %c0_i32_0 = arith.constant 0 : i32
    %c0_i32_1 = arith.constant 0 : i32
    %c0_i32_2 = arith.constant 0 : i32
    return %c0_i32, %c0_i32_0, %c0_i32_1 : i32, i32, i32
  }
}

</mosaic_0001>

<bundles_post_ra>
// kernel: reverse
= control target key start
LH: loop header
LB: loop body
LE: loop exit
PB: predicated region body
PF: predicated region fallthrough
CT: control target
= control target key end

     0   :  { %v2_v0 = vlaneseq  ;;  %s105_s0 = inlined_call_operand.vmem [shape: f32[3,1], index: 0, kind: input, shape index: {}]   ;;  %s106_s1 = inlined_call_operand.vmem [shape: f32[3,1], index: 1, kind: output, shape index: {}]  }
   0x2   :  { %v3_v1 = vsub.s32 2, %v2_v0 }
   0x4   :  { %4 = vset.pattern.permute.xlu0 %v3_v1 }
   0x5   :  { %v20_v2 = vld [vmem:[%s105_s0] sm:$0x1] }
   0x6   :  { %21 = vst [vmem:[#allocation1] sm:$0x1] %v20_v2 }
   0xd   :  { %v38_v3 = vld [vmem:[#allocation1] sm:$0x1] }
   0xe   :  { %39 = vst [vmem:[#allocation0] sm:$0x1] %v38_v3 }
  0x15   :  { %v40_v4 = vld [vmem:[#allocation0] sm:$0xff] }
  0x16   :  { %41 = vperm.xlu0 %4, %v40_v4  }
  0x95   :  { %v42_v5 = vpop.permute.xlu0 %41 }
  0x96   :  { %43 = vst [vmem:[#allocation2] sm:$0xff] %v42_v5 }
  0x9d   :  { %v47_v6 = vld [vmem:[#allocation2] sm:$0x1] }
  0x9e   :  { %49 = vst [vmem:[#allocation3] sm:$0x1] %v47_v6 }
  0xa5   :  { %v65_v7 = vld [vmem:[#allocation3] sm:$0x1] }
  0xa6   :  { %66 = vst [vmem:[%s106_s1] sm:$0x1] %v65_v7 }

// kernel: ulap_forward.2
= control target key start
LH: loop header
LB: loop body
LE: loop exit
PB: predicated region body
PF: predicated region fallthrough
CT: control target
= control target key end

     0   :  { %9 = vsyncpa [#allocation3], 0  ;;  %s335_s0 = inlined_call_operand.hbm [shape: f32[3,16,16], index: 0, kind: input, shape index: {}]   ;;  %s336_s1 = inlined_call_operand.hbm [shape: f32[16,16], index: 1, kind: output, shape index: {0}]   ;;  %s337_s2 = inlined_call_operand.hbm [shape: f32[1,1], index: 2, kind: output, shape index: {1}]   ;;  %s338_s3 = inlined_call_operand.hbm [shape: f32[1,1], index: 3, kind: output, shape index: {2}]  }
   0x1   :  { %10 = vsyncpa [#allocation4], 0 }
   0x2   :  { %11 = vsyncpa [#allocation7], 0  ;;  %s253_s12 = smov [#allocation2]   ;;  %s159_s16 = scalar_lea.hbm %s335_s0, 768 }
   0x3   :  { %s17_s13 = sshll.u32 %s253_s12, 4  ;;  %p160_p0 = scmp.ne.s32.totalorder %s335_s0, %s159_s16  ;;  %s18_s13 = int_to_ptr.vmem [resolvable:$true] %s17_s13 }
   0x4   :  { %p163_p1 = scmp.lt.u32.totalorder %s159_s16, %s335_s0 }
   0x6   :  { %p165_p2 = pnand %p163_p1, %p160_p0 }
   0x8   :  { %168 = shalt.err (!%p165_p2)
}
   0x9   :  { %s169_s21 = scalar_lea.vmem %s18_s13, 768  ;;  %p174_p4 = scmp.lt.s32.totalorder %s18_s13, %s18_s13 }
   0xa   :  { %p170_p3 = scmp.ne.s32.totalorder %s18_s13, %s169_s21  ;;  %p175_p5 = scmp.lt.s32.totalorder %s169_s21, %s169_s21 }
   0xc   :  { %p176_p6 = por %p175_p5, %p174_p4 }
   0xe   :  { %p177_p7 = pnand %p176_p6, %p170_p3 }
  0x10   :  { %180 = shalt.err (!%p177_p7)
}
  0x11   :  { %s254_s22 = smov 128   ;;  %s255_s23 = smov 8  }
  0x12   :  { %23 = dma.hbm_to_vmem [thread:$0]  %s335_s0, 768, %s18_s13, [#allocation3], %s254_s22, %s254_s22, %s255_s23  }
  0x13   :  { %247 = dma.done.wait [#allocation3], 768  }
  0x14   :  { %248 = vsyncadd [#allocation3], 4294966528  ;;  %v27_v0 = vld [vmem:[#allocation2] sm:$0xff]  ;;  %v28_v1 = vld [vmem:[#allocation2 + $0x8] sm:$0xff]  ;;  %vm73_vm0 = vcmask 130048   ;;  %s256_s0 = smov [#allocation5]  }
  0x15   :  { %v29_v2 = vld [vmem:[#allocation2 + $0x10] sm:$0xff]  ;;  %v30_v3 = vld [vmem:[#allocation2 + $0x18] sm:$0xff]  ;;  %v31_v4 = vld [vmem:[#allocation2 + $0x20] sm:$0xff]  ;;  %v33_v6 = vmul.f32 255.0, %v27_v0  ;;  %v34_v7 = vmul.f32 255.0, %v28_v1  ;;  %s110_s26 = sshll.u32 %s256_s0, 4  ;;  %s111_s26 = int_to_ptr.vmem [resolvable:$true] %s110_s26 }
  0x16   :  { %v32_v5 = vld [vmem:[#allocation2 + $0x28] sm:$0xff]  ;;  %v35_v8 = vmul.f32 255.0, %v29_v2  ;;  %v36_v9 = vmul.f32 255.0, %v30_v3  ;;  %v37_v10 = vmul.f32 255.0, %v31_v4  ;;  %s181_s27 = scalar_lea.vmem %s111_s26, 256  ;;  %p186_p9 = scmp.lt.s32.totalorder %s111_s26, %s111_s26 }
  0x17   :  { %v38_v11 = vmul.f32 255.0, %v32_v5  ;;  %v39_v12 = vfloor.f32 %v33_v6  ;;  %v40_v13 = vfloor.f32 %v34_v7  ;;  %p182_p8 = scmp.ne.s32.totalorder %s111_s26, %s181_s27  ;;  %p187_p10 = scmp.lt.s32.totalorder %s181_s27, %s181_s27 }
  0x18   :  { %v41_v14 = vfloor.f32 %v35_v8  ;;  %v42_v15 = vfloor.f32 %v36_v9  ;;  %v43_v16 = vfloor.f32 %v37_v10 }
  0x19   :  { %v44_v17 = vfloor.f32 %v38_v11  ;;  %v45_v18 = vmax.f32 %v39_v12, 0.0  ;;  %v46_v19 = vmax.f32 %v40_v13, 0.0  ;;  %p188_p11 = por %p187_p10, %p186_p9 }
  0x1a   :  { %v47_v20 = vmax.f32 %v41_v14, 0.0  ;;  %v48_v21 = vmax.f32 %v42_v15, 0.0  ;;  %v49_v22 = vmax.f32 %v43_v16, 0.0 }
  0x1b   :  { %v50_v23 = vmax.f32 %v44_v17, 0.0  ;;  %v51_v24 = vmin.f32 %v45_v18, 255.0  ;;  %v52_v25 = vmin.f32 %v46_v19, 255.0  ;;  %p189_p12 = pnand %p188_p11, %p182_p8 }
  0x1c   :  { %v53_v26 = vmin.f32 %v47_v20, 255.0  ;;  %v54_v27 = vmin.f32 %v48_v21, 255.0  ;;  %v55_v28 = vmin.f32 %v49_v22, 255.0 }
  0x1d   :  { %v56_v29 = vmin.f32 %v50_v23, 255.0  ;;  %v57_v30 = vmul.f32 0.003921569, %v51_v24  ;;  %v58_v31 = vmul.f32 0.003921569, %v52_v25 }
  0x1e   :  { %v59_v32 = vmul.f32 0.003921569, %v53_v26  ;;  %v60_v33 = vmul.f32 0.003921569, %v54_v27  ;;  %v61_v34 = vmul.f32 0.003921569, %v55_v28 }
  0x1f   :  { %v62_v35 = vmul.f32 0.003921569, %v56_v29  ;;  %v69_v38 = vmul.f32 -0.9051112, %v57_v30  ;;  %v70_v41 = vmul.f32 -0.9051112, %v58_v31 }
  0x20   :  { %v63_v36 = vmax.f32 %v59_v32, %v61_v34 }
  0x21   :  { %v64_v37 = vmax.f32 %v60_v33, %v62_v35 }
  0x22   :  { %v65_v39 = vmul.f32 0.50516164, %v63_v36 }
  0x23   :  { %v66_v40 = vmul.f32 0.50516164, %v64_v37 }
  0x24   :  { %v67_v42 = vadd.f32 0.5115795, %v65_v39 }
  0x25   :  { %v68_v43 = vadd.f32 0.5115795, %v66_v40 }
  0x26   :  { %v71_v44 = vadd.f32 %v69_v38, %v67_v42 }
  0x27   :  { %v72_v45 = vadd.f32 %v70_v41, %v68_v43 }
  0x28   :  { %v76_v46 = vsel %vm73_vm0, %v71_v44, inf  ;;  %74 = vst.msk [vmem:[#allocation5] sm:$0xff] %vm73_vm0, %v71_v44  ;;  %v91_v48 = vsel %vm73_vm0, %v71_v44, -inf }
  0x29   :  { %v77_v47 = vsel %vm73_vm0, %v72_v45, inf  ;;  %75 = vst.msk [vmem:[#allocation5 + $0x8] sm:$0xff] %vm73_vm0, %v72_v45  ;;  %v92_v49 = vsel %vm73_vm0, %v72_v45, -inf }
  0x2a   :  { %v78_v50 = vmin.f32 %v76_v46, %v77_v47  ;;  %v93_v51 = vmax.f32 %v91_v48, %v92_v49 }
  0x2c   :  { %79 = vmin.xlane.f32.xlu0 %v78_v50 }
  0x30   :  { %94 = vmax.xlane.f32.xlu0 %v93_v51 }
  0x31   :  { %192 = shalt.err (!%p189_p12)
}
  0x32   :  { %s193_s30 = scalar_lea.hbm %s336_s1, 256 }
  0x33   :  { %p194_p13 = scmp.ne.s32.totalorder %s336_s1, %s193_s30  ;;  %p197_p0 = scmp.lt.u32.totalorder %s193_s30, %s336_s1 }
  0x35   :  { %p199_p1 = pnand %p197_p0, %p194_p13 }
  0x37   :  { %202 = shalt.err (!%p199_p1)
}
  0x38   :  { %116 = dma.vmem_to_hbm [thread:$0]  %s111_s26, 256, %s336_s1, [#allocation4], %s254_s22, %s254_s22, %s255_s23   ;;  %vm89_vm1 = vcmask 0  }
  0x39   :  { %s257_s10 = smov [#allocation6]   ;;  %s258_s12 = smov [#allocation8]  }
  0x3a   :  { %s123_s11 = sshll.u32 %s257_s10, 4  ;;  %s133_s13 = sshll.u32 %s258_s12, 4  ;;  %s124_s11 = int_to_ptr.vmem [resolvable:$true] %s123_s11  ;;  %s134_s13 = int_to_ptr.vmem [resolvable:$true] %s133_s13 }
  0x3b   :  { %s203_s14 = scalar_lea.vmem %s124_s11, 16  ;;  %s207_s15 = scalar_lea.vmem %s124_s11, 32 }
  0x3c   :  { %p204_p2 = scmp.ne.s32.totalorder %s124_s11, %s203_s14  ;;  %p208_p3 = scmp.lt.s32.totalorder %s124_s11, %s124_s11 }
  0x3d   :  { %p209_p4 = scmp.lt.s32.totalorder %s207_s15, %s203_s14 }
  0x3f   :  { %p210_p5 = por %p209_p4, %p208_p3 }
  0x41   :  { %p211_p6 = pnand %p210_p5, %p204_p2 }
  0xb9   :  { %v80_v52 = vpop.xlane.xlu0 %79 }
  0xba   :  { %v81_v53 = vrot.slane %v80_v52, 4 }
  0xbc   :  { %v82_v54 = vmin.f32 %v80_v52, %v81_v53 }
  0xbd   :  { %v95_v55 = vpop.xlane.xlu0 %94 }
  0xbe   :  { %v83_v56 = vrot.slane %v82_v54, 2  ;;  %v96_v57 = vrot.slane %v95_v55, 4 }
  0xc0   :  { %v97_v58 = vmax.f32 %v95_v55, %v96_v57  ;;  %v84_v59 = vmin.f32 %v82_v54, %v83_v56 }
  0xc2   :  { %v98_v60 = vrot.slane %v97_v58, 2  ;;  %v85_v61 = vrot.slane %v84_v59, 1 }
  0xc4   :  { %v99_v62 = vmax.f32 %v97_v58, %v98_v60  ;;  %v86_v63 = vmin.f32 %v84_v59, %v85_v61 }
  0xc6   :  { %149 = vpush %v86_v63  ;;  %v100_v0 = vrot.slane %v99_v62, 1 }
  0xc8   :  { %v101_v1 = vmax.f32 %v99_v62, %v100_v0 }
  0xca   :  { %151 = vpush %v101_v1 }
  0xf7   :  { %s150_s1 = spop %149 }
  0xf8   :  { %v88_v2 = vstv %s150_s1 }
  0xf9   :  { %90 = vst.msk [vmem:[#allocation6] sm:$0x1] %vm89_vm1, %v88_v2 }
  0xfa   :  { %214 = shalt.err (!%p211_p6)
}
  0xfb   :  { %s215_s18 = scalar_lea.hbm %s337_s2, 16 }
  0xfc   :  { %p216_p7 = scmp.ne.s32.totalorder %s337_s2, %s215_s18  ;;  %p219_p8 = scmp.lt.u32.totalorder %s215_s18, %s337_s2 }
  0xfe   :  { %p221_p9 = pnand %p219_p8, %p216_p7 }
 0x100   :  { %224 = shalt.err (!%p221_p9)
}
 0x101   :  { %126 = dma.vmem_to_hbm [thread:$0]  %s124_s11, 16, %s337_s2, [#allocation7]  }
 0x102   :  { %s152_s25 = spop %151  ;;  %s225_s0 = scalar_lea.vmem %s134_s13, 16 }
 0x103   :  { %v103_v3 = vstv %s152_s25  ;;  %p226_p10 = scmp.ne.s32.totalorder %s134_s13, %s225_s0  ;;  %s229_s26 = scalar_lea.vmem %s134_s13, 32 }
 0x104   :  { %104 = vst.msk [vmem:[#allocation8] sm:$0x1] %vm89_vm1, %v103_v3  ;;  %p230_p11 = scmp.lt.s32.totalorder %s134_s13, %s134_s13  ;;  %p231_p12 = scmp.lt.s32.totalorder %s229_s26, %s225_s0 }
 0x106   :  { %p232_p13 = por %p231_p12, %p230_p11 }
 0x108   :  { %p233_p0 = pnand %p232_p13, %p226_p10 }
 0x10a   :  { %236 = shalt.err (!%p233_p0)
}
 0x10b   :  { %s237_s29 = scalar_lea.hbm %s338_s3, 16 }
 0x10c   :  { %p238_p1 = scmp.ne.s32.totalorder %s338_s3, %s237_s29  ;;  %p241_p2 = scmp.lt.u32.totalorder %s237_s29, %s338_s3 }
 0x10e   :  { %p243_p3 = pnand %p241_p2, %p238_p1 }
 0x110   :  { %246 = shalt.err (!%p243_p3)
}
 0x111   :  { %136 = dma.vmem_to_hbm [thread:$0]  %s134_s13, 16, %s338_s3, [#allocation7]  }
 0x112   :  { %249 = dma.done.wait [#allocation4], 256  }
 0x113   :  { %250 = vsyncadd [#allocation4], 4294967040 }
 0x114   :  { %251 = dma.done.wait [#allocation7], 32  }
 0x115   :  { %252 = vsyncadd [#allocation7], 4294967264 }
 0x116   :  { %146 = vsyncpa [#allocation3], 1 }
 0x117   :  { %147 = vsyncpa [#allocation4], 1 }
 0x118   :  { %148 = vsyncpa [#allocation7], 1 }

// kernel: ulap_forward.3
= control target key start
LH: loop header
LB: loop body
LE: loop exit
PB: predicated region body
PF: predicated region fallthrough
CT: control target
= control target key end

     0   :  { %9 = vsyncpa [#allocation3], 0  ;;  %s1848_s0 = inlined_call_operand.hbm [shape: f32[3,16,16], index: 0, kind: input, shape index: {}]   ;;  %s1849_s1 = inlined_call_operand.hbm [shape: f32[5], index: 1, kind: input, shape index: {}]   ;;  %s1850_s2 = inlined_call_operand.hbm [shape: bf16[16,16], index: 2, kind: input, shape index: {}]   ;;  %s1851_s3 = inlined_call_operand.hbm [shape: bf16[16,16], index: 3, kind: input, shape index: {}]   ;;  %s1852_s4 = inlined_call_operand.hbm [shape: f32[3,16,16], index: 4, kind: output, shape index: {}]  }
   0x1   :  { %10 = vsyncpa [#allocation5], 0 }
   0x2   :  { %11 = vsyncpa [#allocation8], 0 }
   0x3   :  { %12 = vsyncpa [#allocation4], 0  ;;  %s1533_s15 = smov [#allocation7]   ;;  %s1427_s19 = scalar_lea.hbm %s1850_s2, 128 }
   0x4   :  { %s38_s16 = sshll.u32 %s1533_s15, 4  ;;  %p1428_p0 = scmp.ne.s32.totalorder %s1850_s2, %s1427_s19  ;;  %s39_s16 = int_to_ptr.vmem [resolvable:$true] %s38_s16 }
   0x5   :  { %p1431_p1 = scmp.lt.u32.totalorder %s1427_s19, %s1850_s2 }
   0x7   :  { %p1433_p2 = pnand %p1431_p1, %p1428_p0 }
   0x9   :  { %1436 = shalt.err (!%p1433_p2)
}
   0xa   :  { %s1437_s24 = scalar_lea.vmem %s39_s16, 128  ;;  %p1442_p4 = scmp.lt.s32.totalorder %s39_s16, %s39_s16 }
   0xb   :  { %p1438_p3 = scmp.ne.s32.totalorder %s39_s16, %s1437_s24  ;;  %p1443_p5 = scmp.lt.s32.totalorder %s1437_s24, %s1437_s24 }
   0xd   :  { %p1444_p6 = por %p1443_p5, %p1442_p4 }
   0xf   :  { %p1445_p7 = pnand %p1444_p6, %p1438_p3 }
  0x11   :  { %1448 = shalt.err (!%p1445_p7)
}
  0x12   :  { %s1534_s25 = smov 64   ;;  %s1535_s26 = smov 4  }
  0x13   :  { %44 = dma.hbm_to_vmem [thread:$0]  %s1850_s2, 128, %s39_s16, [#allocation8], %s1534_s25, %s1534_s25, %s1535_s26  }
  0x14   :  { %s1536_s29 = smov [#allocation2]   ;;  %s1449_s7 = scalar_lea.hbm %s1848_s0, 768 }
  0x15   :  { %s18_s30 = sshll.u32 %s1536_s29, 4  ;;  %p1450_p8 = scmp.ne.s32.totalorder %s1848_s0, %s1449_s7  ;;  %s19_s30 = int_to_ptr.vmem [resolvable:$true] %s18_s30 }
  0x16   :  { %p1453_p9 = scmp.lt.u32.totalorder %s1449_s7, %s1848_s0 }
  0x18   :  { %p1455_p10 = pnand %p1453_p9, %p1450_p8 }
  0x1a   :  { %1458 = shalt.err (!%p1455_p10)
}
  0x1b   :  { %s1459_s12 = scalar_lea.vmem %s19_s30, 768  ;;  %p1464_p12 = scmp.lt.s32.totalorder %s19_s30, %s19_s30 }
  0x1c   :  { %p1460_p11 = scmp.ne.s32.totalorder %s19_s30, %s1459_s12  ;;  %p1465_p13 = scmp.lt.s32.totalorder %s1459_s12, %s1459_s12 }
  0x1e   :  { %p1466_p0 = por %p1465_p13, %p1464_p12 }
  0x20   :  { %p1467_p1 = pnand %p1466_p0, %p1460_p11 }
  0x22   :  { %1470 = shalt.err (!%p1467_p1)
}
  0x23   :  { %s1537_s2 = smov 128   ;;  %s1538_s13 = smov 8  }
  0x24   :  { %24 = dma.hbm_to_vmem [thread:$0]  %s1848_s0, 768, %s19_s30, [#allocation3], %s1537_s2, %s1537_s2, %s1538_s13  }
  0x25   :  { %s1471_s18 = scalar_lea.hbm %s1849_s1, 16 }
  0x26   :  { %p1472_p2 = scmp.ne.s32.totalorder %s1849_s1, %s1471_s18  ;;  %p1475_p3 = scmp.lt.u32.totalorder %s1471_s18, %s1849_s1 }
  0x28   :  { %p1477_p4 = pnand %p1475_p3, %p1472_p2 }
  0x2a   :  { %1480 = shalt.err (!%p1477_p4)
}
  0x2b   :  { %s1539_s23 = smov [#allocation6]   ;;  %s1540_s0 = smov [#allocation9]  }
  0x2c   :  { %32 = dma.hbm_to_smem %s1849_s1, 16, %s1539_s23, [#allocation5]  }
  0x2d   :  { %s50_s28 = sshll.u32 %s1540_s0, 4  ;;  %s1481_s5 = scalar_lea.hbm %s1851_s3, 128  ;;  %s51_s28 = int_to_ptr.vmem [resolvable:$true] %s50_s28 }
  0x2e   :  { %p1482_p5 = scmp.ne.s32.totalorder %s1851_s3, %s1481_s5  ;;  %p1485_p6 = scmp.lt.u32.totalorder %s1481_s5, %s1851_s3 }
  0x30   :  { %p1487_p7 = pnand %p1485_p6, %p1482_p5 }
  0x32   :  { %1490 = shalt.err (!%p1487_p7)
}
  0x33   :  { %s1491_s10 = scalar_lea.vmem %s51_s28, 128  ;;  %p1496_p9 = scmp.lt.s32.totalorder %s51_s28, %s51_s28 }
  0x34   :  { %p1492_p8 = scmp.ne.s32.totalorder %s51_s28, %s1491_s10  ;;  %p1497_p10 = scmp.lt.s32.totalorder %s1491_s10, %s1491_s10 }
  0x36   :  { %p1498_p11 = por %p1497_p10, %p1496_p9 }
  0x38   :  { %p1499_p12 = pnand %p1498_p11, %p1492_p8 }
  0x3a   :  { %1502 = shalt.err (!%p1499_p12)
}
  0x3b   :  { %56 = dma.hbm_to_vmem [thread:$0]  %s1851_s3, 128, %s51_s28, [#allocation8], %s1534_s25, %s1534_s25, %s1535_s26  }
  0x3c   :  { %1525 = dma.done.wait [#allocation3], 768  }
  0x3d   :  { %1526 = vsyncadd [#allocation3], 4294966528 }
  0x3e   :  { %1527 = dma.done.wait [#allocation5], 16  }
  0x3f   :  { %1528 = vsyncadd [#allocation5], 4294967280 }
  0x40   :  { %1529 = dma.done.wait [#allocation8], 256  }
  0x41   :  { %1530 = vsyncadd [#allocation8], 4294967040 }
  0x42   :  { %69 = sfence }
  0x43   :  { %v1626_v0 = vld [vmem:[#allocation9] sm:$0xff]   ;;  %v71_v1 = vld [vmem:[#allocation2] sm:$0xff]  ;;  %v72_v2 = vld [vmem:[#allocation2 + $0x8] sm:$0xff]  ;;  %s1628_s12 = sld [smem:[#allocation6]]  ;;  %s1632_s3 = sld [smem:[#allocation6 + $0x1]]  ;;  %vm224_vm0 = vcmask 130048  }
  0x44   :  { %v73_v3 = vld [vmem:[#allocation2 + $0x10] sm:$0xff]  ;;  %1262 = vmatprep.subr.bf16.mxu0 %v1626_v0  ;;  %v74_v4 = vld [vmem:[#allocation2 + $0x18] sm:$0xff]  ;;  %v75_v5 = vld [vmem:[#allocation2 + $0x20] sm:$0xff]  ;;  %v77_v7 = vmul.f32 255.0, %v71_v1  ;;  %v78_v8 = vmul.f32 255.0, %v72_v2  ;;  %s1634_s25 = sld [smem:[#allocation6 + $0x2]] }
  0x45   :  { %v76_v6 = vld [vmem:[#allocation2 + $0x28] sm:$0xff]  ;;  %v79_v9 = vmul.f32 255.0, %v73_v3  ;;  %1263 = vmatpush3.bf16.msra.mxu0 %v1626_v0  ;;  %v80_v10 = vmul.f32 255.0, %v74_v4  ;;  %v81_v11 = vmul.f32 255.0, %v75_v5  ;;  %s1636_s26 = sld [smem:[#allocation6 + $0x3]]  ;;  %s1638_s14 = sld [smem:[#allocation6 + $0x4]] }
  0x46   :  { %v82_v12 = vmul.f32 255.0, %v76_v6  ;;  %v83_v13 = vfloor.f32 %v77_v7  ;;  %v84_v14 = vfloor.f32 %v78_v8  ;;  %vm1542_vm1 = vmmov 0   ;;  %s1543_s0 = smov [#allocation10]  }
  0x47   :  { %v85_v15 = vfloor.f32 %v79_v9  ;;  %v86_v16 = vfloor.f32 %v80_v10  ;;  %v87_v17 = vfloor.f32 %v81_v11  ;;  %s1170_s28 = sshll.u32 %s1543_s0, 4  ;;  %s1171_s28 = int_to_ptr.vmem [resolvable:$true] %s1170_s28 }
  0x48   :  { %v88_v18 = vfloor.f32 %v82_v12  ;;  %v1640_v19 = vmax.f32 %v83_v13, 0.0  ;;  %v1642_v20 = vmax.f32 %v84_v14, 0.0  ;;  %s1503_s29 = scalar_lea.vmem %s1171_s28, 768  ;;  %p1508_p0 = scmp.lt.s32.totalorder %s1171_s28, %s1171_s28 }
  0x49   :  { %v1644_v21 = vmax.f32 %v85_v15, 0.0  ;;  %v1646_v22 = vmax.f32 %v86_v16, 0.0  ;;  %v1648_v23 = vmax.f32 %v87_v17, 0.0  ;;  %s131_s15 = ssub.f32 1.0, %s1628_s12  ;;  %v133_v46 = vstv %s1628_s12  ;;  %s1091_s23 = smul.f32 255.0, %s1628_s12 }
  0x4a   :  { %v1650_v24 = vmax.f32 %v88_v18, 0.0  ;;  %v95_v25 = vmin.f32 %v1640_v19, 255.0  ;;  %v96_v26 = vmin.f32 %v1642_v20, 255.0  ;;  %s142_s16 = ssub.f32 1.0, %s1632_s3  ;;  %v144_v56 = vstv %s1632_s3  ;;  %s1118_s24 = smul.f32 255.0, %s1632_s3 }
  0x4b   :  { %v97_v27 = vmin.f32 %v1644_v21, 255.0  ;;  %v98_v28 = vmin.f32 %v1646_v22, 255.0  ;;  %v99_v29 = vmin.f32 %v1648_v23, 255.0  ;;  %s132_s17 = smax.f32 %s131_s15, %s1628_s12  ;;  %s125_s18 = ssub.f32 %s1638_s14, %s1636_s26  ;;  %v157_v59 = vstv %s1634_s25 }
  0x4c   :  { %v100_v30 = vmin.f32 %v1650_v24, 255.0  ;;  %v105_v32 = vmul.f32 0.003921569, %v95_v25  ;;  %v106_v33 = vmul.f32 0.003921569, %v96_v26  ;;  %s155_s19 = ssub.f32 1.0, %s1634_s25  ;;  %v138_v39 = vstv %s132_s17  ;;  %s143_s20 = smax.f32 %s1632_s3, %s142_s16 }
  0x4d   :  { %v103_v31 = vmul.f32 0.003921569, %v97_v27  ;;  %v101_v34 = vmul.f32 0.003921569, %v99_v29  ;;  %v104_v36 = vmul.f32 0.003921569, %v98_v28  ;;  %1391 = vrcp.f32 %v138_v39  ;;  %p1504_p13 = scmp.ne.s32.totalorder %s1171_s28, %s1503_s29  ;;  %p1509_p1 = scmp.lt.s32.totalorder %s1503_s29, %s1503_s29 }
  0x4e   :  { %v102_v35 = vmul.f32 0.003921569, %v100_v30  ;;  %s126_s21 = sadd.f32 1e-12, %s125_s18  ;;  %s156_s22 = smax.f32 %s1634_s25, %s155_s19  ;;  %v149_v49 = vstv %s143_s20  ;;  %v118_v60 = vmul.f32 -0.9051112, %v105_v32  ;;  %v158_v3 = vsub.f32 %v105_v32, %v157_v59 }
  0x4f   :  { %v196_v37 = vadd.f32 %v103_v31, %v101_v34  ;;  %v112_v40 = vmax.f32 %v103_v31, %v101_v34  ;;  %v162_v50 = vstv %s156_s22  ;;  %v134_v55 = vsub.f32 %v101_v34, %v133_v46  ;;  %s1145_s27 = smul.f32 255.0, %s1634_s25  ;;  %p1510_p2 = por %p1509_p1, %p1508_p0 }
  0x50   :  { %v197_v38 = vadd.f32 %v104_v36, %v102_v35  ;;  %v113_v41 = vmax.f32 %v104_v36, %v102_v35  ;;  %v127_v54 = vstv %s126_s21  ;;  %1393 = vrcp.f32 %v149_v49 }
  0x51   :  { %v198_v42 = vadd.f32 %v196_v37, %v105_v32  ;;  %v114_v47 = vmul.f32 0.50516164, %v112_v40  ;;  %v135_v58 = vsub.f32 %v102_v35, %v133_v46  ;;  %1395 = vrcp.f32 %v162_v50  ;;  %p1511_p3 = pnand %p1510_p2, %p1504_p13 }
  0x52   :  { %v199_v43 = vadd.f32 %v197_v38, %v106_v33  ;;  %v115_v48 = vmul.f32 0.50516164, %v113_v41  ;;  %v119_v61 = vmul.f32 -0.9051112, %v106_v33  ;;  %1397 = vrcp.f32 %v127_v54 }
  0x53   :  { %v1678_v44 = vmul.f32 0.33333334, %v198_v42  ;;  %v116_v62 = vadd.f32 0.5115795, %v114_v47  ;;  %v145_v1 = vsub.f32 %v103_v31, %v144_v56  ;;  %v146_v2 = vsub.f32 %v104_v36, %v144_v56 }
  0x54   :  { %v1680_v45 = vmul.f32 0.33333334, %v199_v43  ;;  %v117_v63 = vadd.f32 0.5115795, %v115_v48  ;;  %v159_v4 = vsub.f32 %v106_v33, %v157_v59  ;;  %v136_v5 = vand.u32 2147483647, %v134_v55 }
  0x55   :  { %v202_v52 = vmul.f32 %v1678_v44, %v1678_v44  ;;  %v137_v6 = vand.u32 2147483647, %v135_v58  ;;  %v120_v8 = vadd.f32 %v118_v60, %v116_v62  ;;  %v147_v10 = vand.u32 2147483647, %v145_v1 }
  0x56   :  { %v210_v51 = vpack.c.bf16 %v1680_v45, %v1678_v44  ;;  %v203_v53 = vmul.f32 %v1680_v45, %v1680_v45  ;;  %v121_v9 = vadd.f32 %v119_v61, %v117_v63  ;;  %v148_v11 = vand.u32 2147483647, %v146_v2 }
  0x57   :  { %v1392_v7 = vpop.eup %1391  ;;  %v122_v12 = vstv %s1636_s26  ;;  %v160_v13 = vand.u32 2147483647, %v158_v3  ;;  %v161_v14 = vand.u32 2147483647, %v159_v4 }
  0x58   :  { %1264 = vmatprep.mubr.msk.bf16.mxu0 %vm224_vm0, %v210_v51  ;;  %v211_v57 = vpack.c.bf16 %v203_v53, %v202_v52  ;;  %v140_v15 = vmul.f32 %v1392_v7, %v136_v5  ;;  %v141_v16 = vmul.f32 %v1392_v7, %v137_v6  ;;  %v123_v34 = vsub.f32 %v120_v8, %v122_v12 }
  0x59   :  { %v124_v35 = vsub.f32 %v121_v9, %v122_v12 }
  0x5a   :  { %1265 = vmatmul.mubr.msk.bf16.vlgmr.msra.gmra.mrb[0].mxu0 %vm224_vm0, %v211_v57  ;;  %v1394_v17 = vpop.eup %1393 }
  0x5b   :  { %v1396_v18 = vpop.eup %1395  ;;  %v151_v31 = vmul.f32 %v1394_v17, %v147_v10  ;;  %v152_v36 = vmul.f32 %v1394_v17, %v148_v11 }
  0x5c   :  { %v1398_v32 = vpop.eup %1397  ;;  %v164_v33 = vmul.f32 %v1396_v18, %v160_v13  ;;  %v165_v37 = vmul.f32 %v1396_v18, %v161_v14 }
  0x5d   :  { %v153_v38 = vmax.f32 %v140_v15, %v151_v31  ;;  %v154_v39 = vmax.f32 %v141_v16, %v152_v36  ;;  %v129_v40 = vmul.f32 %v1398_v32, %v123_v34  ;;  %v130_v41 = vmul.f32 %v1398_v32, %v124_v35 }
  0x5e   :  { %v1541_v34 = vmov 0.0  }
  0x5f   :  { %v166_v42 = vmax.f32 %v153_v38, %v164_v33  ;;  %v167_v43 = vmax.f32 %v154_v39, %v165_v37  ;;  %1280 = vmatprep.subr.bf16.mxu1 %v1541_v34  ;;  %1304 = vmatprep.subr.bf16.mxu0 %v1541_v34  ;;  %v1712_v38 = vld [vmem:[#allocation7] sm:$0xff]  }
  0x60   :  { %1282 = vmatprep.mubr.msk.bf16.mxu1 %vm1542_vm1, %v1541_v34 }
  0x61   :  { %v168_v46 = vsub.f32 1.0, %v166_v42  ;;  %v169_v47 = vsub.f32 1.0, %v167_v43 }
  0x63   :  { %v170_v48 = vadd.f32 %v168_v46, %v129_v40  ;;  %v171_v49 = vadd.f32 %v169_v47, %v130_v41 }
  0x65   :  { %v172_v50 = vmul.f32 8.0, %v170_v48  ;;  %v173_v51 = vmul.f32 8.0, %v171_v49 }
  0x67   :  { %v174_v52 = vmul.f32 -0.030459208, %v172_v50  ;;  %v175_v53 = vmul.f32 -0.030459208, %v173_v51  ;;  %v180_v54 = vmul.f32 -0.051293295, %v172_v50 }
  0x68   :  { %v181_v55 = vmul.f32 -0.051293295, %v173_v51  ;;  %v186_v56 = vmul.f32 -0.18632957, %v172_v50  ;;  %v187_v57 = vmul.f32 -0.18632957, %v173_v51 }
  0x69   :  { %v176_v58 = vmul.f32 1.442695, %v174_v52  ;;  %v178_v59 = vmul.f32 1.442695, %v175_v53  ;;  %v182_v60 = vmul.f32 1.442695, %v180_v54 }
  0x6a   :  { %v184_v61 = vmul.f32 1.442695, %v181_v55  ;;  %v188_v62 = vmul.f32 1.442695, %v186_v56  ;;  %v190_v63 = vmul.f32 1.442695, %v187_v57 }
  0x6b   :  { %1399 = vpow2.f32 %v176_v58 }
  0x6c   :  { %1401 = vpow2.f32 %v178_v59 }
  0x6d   :  { %1403 = vpow2.f32 %v182_v60 }
  0x6e   :  { %1405 = vpow2.f32 %v184_v61 }
  0x6f   :  { %1407 = vpow2.f32 %v188_v62 }
  0x70   :  { %1409 = vpow2.f32 %v190_v63 }
  0x75   :  { %v1400_v1 = vpop.eup %1399 }
  0x76   :  { %v1402_v2 = vpop.eup %1401  ;;  %v204_v10 = vmul.f32 %v1400_v1, %v1678_v44 }
  0x77   :  { %v1404_v3 = vpop.eup %1403  ;;  %v212_v4 = vpack.c.bf16 %v1402_v2, %v1400_v1  ;;  %v205_v11 = vmul.f32 %v1402_v2, %v1680_v45 }
  0x78   :  { %v1406_v5 = vpop.eup %1405  ;;  %v206_v12 = vmul.f32 %v1404_v3, %v1678_v44 }
  0x79   :  { %v1408_v6 = vpop.eup %1407  ;;  %1268 = vmatprep.mubr.msk.bf16.mxu0 %vm224_vm0, %v212_v4  ;;  %v213_v7 = vpack.c.bf16 %v1406_v5, %v1404_v3  ;;  %v207_v13 = vmul.f32 %v1406_v5, %v1680_v45  ;;  %v215_v14 = vpack.c.bf16 %v205_v11, %v204_v10 }
  0x7a   :  { %v1410_v8 = vpop.eup %1409  ;;  %v208_v16 = vmul.f32 %v1408_v6, %v1678_v44 }
  0x7b   :  { %1269 = vmatmul.mubr.msk.bf16.gmra.mrb[4].mxu0 %vm224_vm0, %v213_v7  ;;  %v214_v9 = vpack.c.bf16 %v1410_v8, %v1408_v6  ;;  %v216_v15 = vpack.c.bf16 %v207_v13, %v206_v12  ;;  %v209_v17 = vmul.f32 %v1410_v8, %v1680_v45 }
  0x7d   :  { %1272 = vmatprep.mubr.msk.bf16.mxu0 %vm224_vm0, %v214_v9  ;;  %v217_v18 = vpack.c.bf16 %v209_v17, %v208_v16 }
  0x83   :  { %1273 = vmatmul.mubr.msk.bf16.gmra.mrb[8].mxu0 %vm224_vm0, %v215_v14 }
  0x84   :  { %1276 = vmatprep.mubr.msk.bf16.mxu0 %vm224_vm0, %v216_v15 }
  0x8b   :  { %1277 = vmatmul.mubr.msk.bf16.gmra.mrb[12].mxu0 %vm224_vm0, %v217_v18 }
  0x8c   :  { %1306 = vmatprep.mubr.msk.bf16.mxu0 %vm1542_vm1, %v1541_v34 }
 0x12d   :  { %v1266_v35 = vpop.f32.mrb[0].mxu0 }
 0x12e   :  { %v283_v31 = vpop.f32.mrb[1].mxu0 }
 0x12f   :  { %v1267_v36 = vpop.f32.mrb[2].mxu0 }
 0x130   :  { %v347_v32 = vpack.c.bf16 %v1267_v36, %v1266_v35  ;;  %v286_v33 = vpop.f32.mrb[3].mxu0 }
 0x131   :  { %v346_v37 = vpack.c.bf16 %v286_v33, %v283_v31 }
 0x133   :  { %1281 = vmatpush3.bf16.msra.mxu1 %v346_v37 }
 0x134   :  { %1286 = vmatprep.subr.bf16.mxu1 %v1541_v34 }
 0x136   :  { %1283 = vmatmul.mubr.msk.bf16.vlgmr.msra.gmra.mrb[0].mxu1 %vm224_vm0, %v1712_v38 }
 0x137   :  { %1287 = vmatpush3.bf16.msra.mxu1 %v347_v32  ;;  %1288 = vmatprep.mubr.msk.bf16.mxu1 %vm1542_vm1, %v1541_v34 }
 0x138   :  { %1292 = vmatprep.subr.bf16.mxu1 %v1541_v34 }
 0x13e   :  { %1289 = vmatmul.mubr.msk.bf16.vlgmr.msra.gmra.mrb[4].mxu1 %vm224_vm0, %v1712_v38 }
 0x13f   :  { %1294 = vmatprep.mubr.msk.bf16.mxu1 %vm1542_vm1, %v1541_v34 }
 0x14e   :  { %v1270_v39 = vpop.f32.mrb[4].mxu0 }
 0x14f   :  { %v299_v40 = vpop.f32.mrb[5].mxu0 }
 0x150   :  { %v1271_v41 = vpop.f32.mrb[6].mxu0 }
 0x151   :  { %v349_v42 = vpack.c.bf16 %v1271_v41, %v1270_v39  ;;  %v302_v43 = vpop.f32.mrb[7].mxu0 }
 0x152   :  { %v348_v46 = vpack.c.bf16 %v302_v43, %v299_v40 }
 0x154   :  { %1293 = vmatpush3.bf16.msra.mxu1 %v348_v46 }
 0x155   :  { %1298 = vmatprep.subr.bf16.mxu1 %v1541_v34 }
 0x156   :  { %v1274_v47 = vpop.f32.mrb[8].mxu0 }
 0x157   :  { %v315_v48 = vpop.f32.mrb[9].mxu0  ;;  %1295 = vmatmul.mubr.msk.bf16.vlgmr.msra.gmra.mrb[8].mxu1 %vm224_vm0, %v1712_v38 }
 0x158   :  { %v1275_v49 = vpop.f32.mrb[10].mxu0  ;;  %1299 = vmatpush3.bf16.msra.mxu1 %v349_v42  ;;  %1300 = vmatprep.mubr.msk.bf16.mxu1 %vm1542_vm1, %v1541_v34 }
 0x159   :  { %v351_v50 = vpack.c.bf16 %v1275_v49, %v1274_v47  ;;  %v318_v51 = vpop.f32.mrb[11].mxu0  ;;  %1310 = vmatprep.subr.bf16.mxu1 %v1541_v34 }
 0x15a   :  { %v350_v52 = vpack.c.bf16 %v318_v51, %v315_v48 }
 0x15c   :  { %1305 = vmatpush3.bf16.msra.mxu0 %v350_v52 }
 0x15d   :  { %1316 = vmatprep.subr.bf16.mxu0 %v1541_v34 }
 0x15e   :  { %v1278_v53 = vpop.f32.mrb[12].mxu0 }
 0x15f   :  { %v331_v54 = vpop.f32.mrb[13].mxu0  ;;  %1301 = vmatmul.mubr.msk.bf16.vlgmr.msra.gmra.mrb[12].mxu1 %vm224_vm0, %v1712_v38  ;;  %1307 = vmatmul.mubr.msk.bf16.vlgmr.msra.gmra.mrb[16].mxu0 %vm224_vm0, %v1712_v38 }
 0x160   :  { %1311 = vmatpush3.bf16.msra.mxu1 %v351_v50  ;;  %v1279_v55 = vpop.f32.mrb[14].mxu0  ;;  %1312 = vmatprep.mubr.msk.bf16.mxu1 %vm1542_vm1, %v1541_v34 }
 0x161   :  { %v353_v56 = vpack.c.bf16 %v1279_v55, %v1278_v53  ;;  %v334_v57 = vpop.f32.mrb[15].mxu0  ;;  %1318 = vmatprep.mubr.msk.bf16.mxu0 %vm1542_vm1, %v1541_v34  ;;  %1322 = vmatprep.subr.bf16.mxu1 %v1541_v34 }
 0x162   :  { %v352_v58 = vpack.c.bf16 %v334_v57, %v331_v54 }
 0x164   :  { %1317 = vmatpush3.bf16.msra.mxu0 %v352_v58 }
 0x165   :  { %1328 = vmatprep.subr.bf16.mxu0 %v1626_v0 }
 0x167   :  { %1313 = vmatmul.mubr.msk.bf16.vlgmr.msra.gmra.mrb[16].mxu1 %vm224_vm0, %v1712_v38  ;;  %1319 = vmatmul.mubr.msk.bf16.vlgmr.msra.gmra.mrb[20].mxu0 %vm224_vm0, %v1712_v38 }
 0x168   :  { %1323 = vmatpush3.bf16.msra.mxu1 %v353_v56  ;;  %1324 = vmatprep.mubr.msk.bf16.mxu1 %vm1542_vm1, %v1541_v34 }
 0x169   :  { %1329 = vmatpush3.bf16.msra.mxu0 %v1626_v0  ;;  %1342 = vmatprep.subr.bf16.mxu1 %v1541_v34 }
 0x16a   :  { %1360 = vmatprep.subr.bf16.mxu0 %v1541_v34 }
 0x16f   :  { %1325 = vmatmul.mubr.msk.bf16.vlgmr.msra.gmra.mrb[20].mxu1 %vm224_vm0, %v1712_v38 }
 0x170   :  { %1344 = vmatprep.mubr.msk.bf16.mxu1 %vm1542_vm1, %v1541_v34 }
 0x209   :  { %v1754_v59 = vpop.f32.mrb[0].mxu1 }
 0x20a   :  { %v1284_v60 = vpop.f32.mrb[1].mxu1  ;;  %v690_v63 = vmul.f32 %v1754_v59, %v1754_v59 }
 0x20b   :  { %v1756_v61 = vpop.f32.mrb[2].mxu1 }
 0x20c   :  { %v1285_v62 = vpop.f32.mrb[3].mxu1  ;;  %v691_v0 = vmul.f32 %v1756_v61, %v1756_v61 }
 0x211   :  { %v437_v1 = vpop.f32.mrb[4].mxu1 }
 0x212   :  { %v692_v2 = vsub.f32 %v437_v1, %v690_v63  ;;  %v1290_v3 = vpop.f32.mrb[5].mxu1 }
 0x213   :  { %v440_v4 = vpop.f32.mrb[6].mxu1 }
 0x214   :  { %v693_v5 = vsub.f32 %v440_v4, %v691_v0  ;;  %v1291_v6 = vpop.f32.mrb[7].mxu1  ;;  %v698_v13 = vadd.f32 0.001, %v692_v2 }
 0x216   :  { %v699_v14 = vadd.f32 0.001, %v693_v5  ;;  %1411 = vrcp.f32 %v698_v13 }
 0x218   :  { %1413 = vrcp.f32 %v699_v14 }
 0x220   :  { %v1412_v49 = vpop.eup %1411 }
 0x222   :  { %v1414_v58 = vpop.eup %1413 }
 0x22a   :  { %v478_v7 = vpop.f32.mrb[8].mxu1 }
 0x22b   :  { %v694_v8 = vmul.f32 %v478_v7, %v1754_v59  ;;  %v1296_v9 = vpop.f32.mrb[9].mxu1 }
 0x22c   :  { %v481_v10 = vpop.f32.mrb[10].mxu1 }
 0x22d   :  { %v695_v11 = vmul.f32 %v481_v10, %v1756_v61  ;;  %v1297_v12 = vpop.f32.mrb[11].mxu1 }
 0x232   :  { %v519_v15 = vpop.f32.mrb[12].mxu1  ;;  %v560_v16 = vpop.f32.mrb[16].mxu0 }
 0x233   :  { %v708_v17 = vmul.f32 %v519_v15, %v1754_v59  ;;  %v718_v18 = vmul.f32 %v560_v16, %v1754_v59  ;;  %v1302_v35 = vpop.f32.mrb[13].mxu1  ;;  %v1308_v31 = vpop.f32.mrb[17].mxu0 }
 0x234   :  { %v522_v36 = vpop.f32.mrb[14].mxu1  ;;  %v563_v32 = vpop.f32.mrb[18].mxu0 }
 0x235   :  { %v709_v33 = vmul.f32 %v522_v36, %v1756_v61  ;;  %v719_v37 = vmul.f32 %v563_v32, %v1756_v61  ;;  %v1303_v39 = vpop.f32.mrb[15].mxu1  ;;  %v1309_v40 = vpop.f32.mrb[19].mxu0 }
 0x23a   :  { %v601_v41 = vpop.f32.mrb[16].mxu1  ;;  %v642_v42 = vpop.f32.mrb[20].mxu0 }
 0x23b   :  { %v696_v43 = vsub.f32 %v601_v41, %v694_v8  ;;  %v710_v46 = vsub.f32 %v642_v42, %v708_v17  ;;  %v1314_v47 = vpop.f32.mrb[17].mxu1  ;;  %v1320_v48 = vpop.f32.mrb[21].mxu0 }
 0x23c   :  { %v604_v50 = vpop.f32.mrb[18].mxu1  ;;  %v645_v51 = vpop.f32.mrb[22].mxu0 }
 0x23d   :  { %v701_v52 = vmul.f32 %v1412_v49, %v696_v43  ;;  %v712_v53 = vmul.f32 %v1412_v49, %v710_v46  ;;  %v697_v54 = vsub.f32 %v604_v50, %v695_v11  ;;  %v711_v55 = vsub.f32 %v645_v51, %v709_v33  ;;  %v1315_v56 = vpop.f32.mrb[19].mxu1  ;;  %v1321_v57 = vpop.f32.mrb[23].mxu0 }
 0x23f   :  { %v704_v60 = vmul.f32 %v701_v52, %v1754_v59  ;;  %v714_v62 = vmul.f32 %v712_v53, %v1754_v59  ;;  %v703_v63 = vmul.f32 %v1414_v58, %v697_v54  ;;  %v713_v0 = vmul.f32 %v1414_v58, %v711_v55 }
 0x241   :  { %v706_v1 = vsub.f32 %v478_v7, %v704_v60  ;;  %v716_v2 = vsub.f32 %v519_v15, %v714_v62  ;;  %v705_v3 = vmul.f32 %v703_v63, %v1756_v61  ;;  %v728_v4 = vpack.c.bf16 %v703_v63, %v701_v52 }
 0x242   :  { %v715_v5 = vmul.f32 %v713_v0, %v1756_v61  ;;  %v730_v6 = vpack.c.bf16 %v713_v0, %v712_v53  ;;  %v683_v8 = vpop.f32.mrb[20].mxu1 }
 0x243   :  { %v707_v9 = vsub.f32 %v481_v10, %v705_v3  ;;  %v720_v11 = vsub.f32 %v683_v8, %v718_v18  ;;  %v1326_v12 = vpop.f32.mrb[21].mxu1  ;;  %1330 = vmatprep.mubr.msk.bf16.mxu0 %vm224_vm0, %v728_v4 }
 0x244   :  { %v717_v13 = vsub.f32 %v522_v36, %v715_v5  ;;  %v686_v14 = vpop.f32.mrb[22].mxu1 }
 0x245   :  { %v729_v17 = vpack.c.bf16 %v707_v9, %v706_v1  ;;  %v722_v35 = vmul.f32 %v1412_v49, %v720_v11  ;;  %v721_v31 = vsub.f32 %v686_v14, %v719_v37  ;;  %v1327_v33 = vpop.f32.mrb[23].mxu1 }
 0x246   :  { %v731_v7 = vpack.c.bf16 %v717_v13, %v716_v2 }
 0x247   :  { %v724_v15 = vmul.f32 %v722_v35, %v1754_v59  ;;  %v723_v39 = vmul.f32 %v1414_v58, %v721_v31  ;;  %1331 = vmatmul.mubr.msk.bf16.vlgmr.msra.gmra.mrb[24].mxu0 %vm224_vm0, %v729_v17 }
 0x248   :  { %1334 = vmatprep.mubr.msk.bf16.mxu0 %vm224_vm0, %v730_v6 }
 0x249   :  { %v726_v40 = vsub.f32 %v560_v16, %v724_v15  ;;  %v725_v10 = vmul.f32 %v723_v39, %v1756_v61  ;;  %v732_v18 = vpack.c.bf16 %v723_v39, %v722_v35  ;;  %v1092_v35 = vstv %s1091_s23 }
 0x24b   :  { %v727_v41 = vsub.f32 %v563_v32, %v725_v10 }
 0x24d   :  { %v733_v42 = vpack.c.bf16 %v727_v41, %v726_v40  ;;  %v1093_v41 = vsub.f32 %v99_v29, %v1092_v35 }
 0x24f   :  { %1335 = vmatmul.mubr.msk.bf16.gmra.mrb[28].mxu0 %vm224_vm0, %v731_v7 }
 0x250   :  { %1338 = vmatprep.mubr.msk.bf16.mxu0 %vm224_vm0, %v732_v18 }
 0x257   :  { %1339 = vmatmul.mubr.msk.bf16.gmra.mrb[32].mxu0 %vm224_vm0, %v733_v42 }
 0x258   :  { %1362 = vmatprep.mubr.msk.bf16.mxu0 %vm1542_vm1, %v1541_v34 }
 0x31a   :  { %v1332_v59 = vpop.f32.mrb[24].mxu0 }
 0x31b   :  { %v786_v36 = vpop.f32.mrb[25].mxu0 }
 0x31c   :  { %v1333_v37 = vpop.f32.mrb[26].mxu0 }
 0x31d   :  { %v834_v43 = vpack.c.bf16 %v1333_v37, %v1332_v59  ;;  %v789_v46 = vpop.f32.mrb[27].mxu0 }
 0x31e   :  { %v833_v16 = vpack.c.bf16 %v789_v46, %v786_v36  ;;  %v1094_v36 = vsub.f32 %v100_v30, %v1092_v35 }
 0x320   :  { %1343 = vmatpush3.bf16.msra.mxu1 %v833_v16 }
 0x321   :  { %1348 = vmatprep.subr.bf16.mxu1 %v1541_v34 }
 0x322   :  { %v1336_v61 = vpop.f32.mrb[28].mxu0 }
 0x323   :  { %v802_v32 = vpop.f32.mrb[29].mxu0  ;;  %1345 = vmatmul.mubr.msk.bf16.vlgmr.msra.gmra.mrb[24].mxu1 %vm224_vm0, %v1712_v38 }
 0x324   :  { %v1337_v47 = vpop.f32.mrb[30].mxu0  ;;  %1349 = vmatpush3.bf16.msra.mxu1 %v834_v43  ;;  %1350 = vmatprep.mubr.msk.bf16.mxu1 %vm1542_vm1, %v1541_v34 }
 0x325   :  { %v836_v48 = vpack.c.bf16 %v1337_v47, %v1336_v61  ;;  %v805_v49 = vpop.f32.mrb[31].mxu0  ;;  %1354 = vmatprep.subr.bf16.mxu1 %v1541_v34 }
 0x326   :  { %v835_v50 = vpack.c.bf16 %v805_v49, %v802_v32  ;;  %v1119_v49 = vstv %s1118_s24 }
 0x327   :  { %1361 = vmatpush3.bf16.msra.mxu0 %v836_v48 }
 0x328   :  { %1372 = vmatprep.subr.bf16.mxu0 %v1541_v34 }
 0x32a   :  { %v1340_v51 = vpop.f32.mrb[32].mxu0  ;;  %1363 = vmatmul.mubr.msk.bf16.vlgmr.msra.gmra.mrb[36].mxu0 %vm224_vm0, %v1712_v38 }
 0x32b   :  { %v818_v52 = vpop.f32.mrb[33].mxu0  ;;  %1351 = vmatmul.mubr.msk.bf16.vlgmr.msra.gmra.mrb[28].mxu1 %vm224_vm0, %v1712_v38  ;;  %1374 = vmatprep.mubr.msk.bf16.mxu0 %vm1542_vm1, %v1541_v34 }
 0x32c   :  { %1355 = vmatpush3.bf16.msra.mxu1 %v835_v50  ;;  %v1341_v53 = vpop.f32.mrb[34].mxu0  ;;  %1356 = vmatprep.mubr.msk.bf16.mxu1 %vm1542_vm1, %v1541_v34 }
 0x32d   :  { %v838_v54 = vpack.c.bf16 %v1341_v53, %v1340_v51  ;;  %v821_v55 = vpop.f32.mrb[35].mxu0  ;;  %1366 = vmatprep.subr.bf16.mxu1 %v1541_v34 }
 0x32e   :  { %v837_v56 = vpack.c.bf16 %v821_v55, %v818_v52 }
 0x32f   :  { %1373 = vmatpush3.bf16.msra.mxu0 %v838_v54 }
 0x332   :  { %1375 = vmatmul.mubr.msk.bf16.vlgmr.msra.gmra.mrb[40].mxu0 %vm224_vm0, %v1712_v38 }
 0x333   :  { %1357 = vmatmul.mubr.msk.bf16.vlgmr.msra.gmra.mrb[32].mxu1 %vm224_vm0, %v1712_v38 }
 0x334   :  { %1367 = vmatpush3.bf16.msra.mxu1 %v837_v56  ;;  %1368 = vmatprep.mubr.msk.bf16.mxu1 %vm1542_vm1, %v1541_v34  ;;  %v1120_v56 = vsub.f32 %v97_v27, %v1119_v49 }
 0x33b   :  { %1369 = vmatmul.mubr.msk.bf16.vlgmr.msra.gmra.mrb[36].mxu1 %vm224_vm0, %v1712_v38 }
 0x3f6   :  { %v873_v57 = vpop.f32.mrb[24].mxu1 }
 0x3f7   :  { %v1346_v58 = vpop.f32.mrb[25].mxu1  ;;  %v1085_v63 = vmul.f32 %v873_v57, %v1678_v44 }
 0x3f8   :  { %v876_v60 = vpop.f32.mrb[26].mxu1  ;;  %v1121_v58 = vsub.f32 %v98_v28, %v1119_v49 }
 0x3f9   :  { %v1347_v62 = vpop.f32.mrb[27].mxu1  ;;  %v1086_v3 = vmul.f32 %v876_v60, %v1680_v45 }
 0x3fd   :  { %v996_v0 = vpop.f32.mrb[36].mxu0 }
 0x3fe   :  { %v914_v1 = vpop.f32.mrb[28].mxu1  ;;  %v1364_v2 = vpop.f32.mrb[37].mxu0 }
 0x3ff   :  { %v1087_v4 = vadd.f32 %v1085_v63, %v914_v1  ;;  %v1352_v5 = vpop.f32.mrb[29].mxu1  ;;  %v999_v6 = vpop.f32.mrb[38].mxu0 }
 0x400   :  { %v917_v8 = vpop.f32.mrb[30].mxu1  ;;  %v1365_v34 = vpop.f32.mrb[39].mxu0 }
 0x401   :  { %v1089_v9 = vmax.f32 %v1087_v4, 0.001  ;;  %v1088_v11 = vadd.f32 %v1086_v3, %v917_v8  ;;  %v1353_v38 = vpop.f32.mrb[31].mxu1  ;;  %v1146_v3 = vstv %s1145_s27 }
 0x402   :  { %v1147_v22 = vsub.f32 %v95_v25, %v1146_v3  ;;  %v1148_v8 = vsub.f32 %v96_v26, %v1146_v3 }
 0x403   :  { %1415 = vrcp.f32 %v1089_v9  ;;  %v1090_v12 = vmax.f32 %v1088_v11, 0.001 }
 0x405   :  { %1417 = vrcp.f32 %v1090_v12  ;;  %v1078_v13 = vpop.f32.mrb[40].mxu0 }
 0x406   :  { %v955_v14 = vpop.f32.mrb[32].mxu1  ;;  %v1376_v17 = vpop.f32.mrb[41].mxu0 }
 0x407   :  { %v1112_v31 = vmul.f32 %v955_v14, %v1678_v44  ;;  %v1358_v33 = vpop.f32.mrb[33].mxu1  ;;  %v1081_v7 = vpop.f32.mrb[42].mxu0 }
 0x408   :  { %v958_v15 = vpop.f32.mrb[34].mxu1  ;;  %v1377_v39 = vpop.f32.mrb[43].mxu0 }
 0x409   :  { %v1113_v40 = vmul.f32 %v958_v15, %v1680_v45  ;;  %v1114_v10 = vadd.f32 %v1112_v31, %v996_v0  ;;  %v1359_v18 = vpop.f32.mrb[35].mxu1 }
 0x40b   :  { %v1116_v42 = vmax.f32 %v1114_v10, 0.001  ;;  %v1115_v59 = vadd.f32 %v1113_v40, %v999_v6 }
 0x40d   :  { %v1416_v37 = vpop.eup %1415  ;;  %1419 = vrcp.f32 %v1116_v42  ;;  %v1117_v43 = vmax.f32 %v1115_v59, 0.001 }
 0x40e   :  { %v1096_v46 = vmul.f32 %v1416_v37, %v1093_v41  ;;  %v1037_v16 = vpop.f32.mrb[36].mxu1 }
 0x40f   :  { %v1418_v61 = vpop.eup %1417  ;;  %1421 = vrcp.f32 %v1117_v43  ;;  %v1139_v32 = vmul.f32 %v1037_v16, %v1678_v44  ;;  %v1370_v47 = vpop.f32.mrb[37].mxu1 }
 0x410   :  { %v1099_v48 = vadd.f32 %v1096_v46, %v1092_v35  ;;  %v1098_v23 = vmul.f32 %v1418_v61, %v1094_v36  ;;  %v1040_v29 = vpop.f32.mrb[38].mxu1 }
 0x411   :  { %v1140_v50 = vmul.f32 %v1040_v29, %v1680_v45  ;;  %v1141_v24 = vadd.f32 %v1139_v32, %v1078_v13  ;;  %v1371_v30 = vpop.f32.mrb[39].mxu1 }
 0x412   :  { %v1101_v51 = vmax.f32 %v1099_v48, 0.0  ;;  %v1100_v52 = vadd.f32 %v1098_v23, %v1092_v35 }
 0x413   :  { %v1143_v53 = vmax.f32 %v1141_v24, 0.001  ;;  %v1142_v54 = vadd.f32 %v1140_v50, %v1081_v7 }
 0x414   :  { %v1102_v55 = vmax.f32 %v1100_v52, 0.0  ;;  %v1103_v57 = vmin.f32 %v1101_v51, 255.0 }
 0x415   :  { %1423 = vrcp.f32 %v1143_v53  ;;  %v1144_v44 = vmax.f32 %v1142_v54, 0.001 }
 0x416   :  { %v1104_v60 = vmin.f32 %v1102_v55, 255.0  ;;  %v1105_v62 = vfloor.f32 %v1103_v57 }
 0x417   :  { %v1420_v45 = vpop.eup %1419  ;;  %1425 = vrcp.f32 %v1144_v44 }
 0x418   :  { %v1123_v63 = vmul.f32 %v1420_v45, %v1120_v56  ;;  %v1106_v0 = vfloor.f32 %v1104_v60  ;;  %v1107_v1 = vmul.f32 0.003921569, %v1105_v62 }
 0x419   :  { %v1422_v2 = vpop.eup %1421 }
 0x41a   :  { %v1126_v4 = vadd.f32 %v1123_v63, %v1119_v49  ;;  %v1125_v5 = vmul.f32 %v1422_v2, %v1121_v58  ;;  %v1108_v21 = vmul.f32 0.003921569, %v1106_v0  ;;  %1110 = vst.msk [vmem:[#allocation10 + $0x20] sm:$0xff] %vm224_vm0, %v1107_v1 }
 0x41c   :  { %v1128_v27 = vmax.f32 %v1126_v4, 0.0  ;;  %v1127_v6 = vadd.f32 %v1125_v5, %v1119_v49  ;;  %1111 = vst.msk [vmem:[#allocation10 + $0x28] sm:$0xff] %vm224_vm0, %v1108_v21 }
 0x41e   :  { %v1129_v28 = vmax.f32 %v1127_v6, 0.0  ;;  %v1130_v34 = vmin.f32 %v1128_v27, 255.0 }
 0x41f   :  { %v1424_v9 = vpop.eup %1423 }
 0x420   :  { %v1150_v11 = vmul.f32 %v1424_v9, %v1147_v22  ;;  %v1131_v38 = vmin.f32 %v1129_v28, 255.0  ;;  %v1132_v12 = vfloor.f32 %v1130_v34 }
 0x421   :  { %v1426_v13 = vpop.eup %1425 }
 0x422   :  { %v1153_v14 = vadd.f32 %v1150_v11, %v1146_v3  ;;  %v1152_v17 = vmul.f32 %v1426_v13, %v1148_v8  ;;  %v1133_v35 = vfloor.f32 %v1131_v38  ;;  %v1134_v31 = vmul.f32 0.003921569, %v1132_v12 }
 0x424   :  { %v1155_v33 = vmax.f32 %v1153_v14, 0.0  ;;  %v1154_v7 = vadd.f32 %v1152_v17, %v1146_v3  ;;  %v1135_v19 = vmul.f32 0.003921569, %v1133_v35  ;;  %1137 = vst.msk [vmem:[#allocation10 + $0x10] sm:$0xff] %vm224_vm0, %v1134_v31 }
 0x426   :  { %v1156_v25 = vmax.f32 %v1154_v7, 0.0  ;;  %1138 = vst.msk [vmem:[#allocation10 + $0x18] sm:$0xff] %vm224_vm0, %v1135_v19  ;;  %v1157_v20 = vmin.f32 %v1155_v33, 255.0 }
 0x428   :  { %v1158_v26 = vmin.f32 %v1156_v25, 255.0  ;;  %v1159_v15 = vfloor.f32 %v1157_v20 }
 0x42a   :  { %v1160_v39 = vfloor.f32 %v1158_v26  ;;  %v1161_v40 = vmul.f32 0.003921569, %v1159_v15 }
 0x42c   :  { %v1162_v10 = vmul.f32 0.003921569, %v1160_v39  ;;  %1163 = vst.msk [vmem:[#allocation10] sm:$0xff] %vm224_vm0, %v1161_v40 }
 0x42e   :  { %1164 = vst.msk [vmem:[#allocation10 + $0x8] sm:$0xff] %vm224_vm0, %v1162_v10 }
 0x42f   :  { %1514 = shalt.err (!%p1511_p3)
}
 0x430   :  { %s1515_s6 = scalar_lea.hbm %s1852_s4, 768 }
 0x431   :  { %p1516_p4 = scmp.ne.s32.totalorder %s1852_s4, %s1515_s6  ;;  %p1519_p5 = scmp.lt.u32.totalorder %s1515_s6, %s1852_s4 }
 0x433   :  { %p1521_p6 = pnand %p1519_p5, %p1516_p4 }
 0x435   :  { %1524 = shalt.err (!%p1521_p6)
}
 0x436   :  { %1176 = dma.vmem_to_hbm [thread:$0]  %s1171_s28, 768, %s1852_s4, [#allocation4], %s1537_s2, %s1537_s2, %s1538_s13  }
 0x437   :  { %1531 = dma.done.wait [#allocation4], 768  }
 0x438   :  { %1532 = vsyncadd [#allocation4], 4294966528 }
 0x439   :  { %1180 = vsyncpa [#allocation3], 1 }
 0x43a   :  { %1181 = vsyncpa [#allocation8], 1 }
 0x43b   :  { %1182 = vsyncpa [#allocation4], 1 }
 0x43c   :  { %1183 = vsyncpa [#allocation5], 1 }

</bundles_post_ra>
